<compile_context>
chip_gen: v7x
topology: tpu7x:2x2x1
jax: 0.10.0
libtpu: 0.0.40
codegen_flags: <defaults>
</compile_context>

<pallas_src>
from functools import partial

import numpy as np
import jax
import jax.numpy as jnp
from jax import lax
from jax.experimental import pallas as pl
from jax.experimental.pallas import tpu as pltpu

# ----------------------------- configuration --------------------------------
# Matches the PyTorch defaults except input_dim, which follows the small test
# input x = (B, 4, 16, 16) NCHW -> flattened dim 1024.
INPUT_DIM = 1024
NUM_INNER = 15
NUM_OUTER = 19
NUM_CTRL = 7
DEGREE = 2
RANGE_MIN = -3.401
RANGE_MAX = 33.232


def _clamped_uniform_knots(num_ctrl, degree, tmin, tmax):
    n_seg = num_ctrl - degree
    internal = [tmin + (tmax - tmin) * i / n_seg for i in range(1, n_seg)]
    return [float(tmin)] * (degree + 1) + internal + [float(tmax)] * (degree + 1)


KNOTS = _clamped_uniform_knots(NUM_CTRL, DEGREE, RANGE_MIN, RANGE_MAX)


# --------------------------- B-spline (pruned) --------------------------------
def _bspline_basis(xc):
    """Pruned Cox–de Boor recursion.

    Statically-zero bases (zero-width intervals from the repeated clamped
    knots) are represented as None and never emit vector ops; divisions are
    replaced with multiplies by Python-precomputed reciprocals; (xc - knot)
    ramps are computed once per unique knot and reused across degrees.
    """
    nk = len(KNOTS)
    ramps = {}

    def ramp(k):
        if k not in ramps:
            ramps[k] = xc - k
        return ramps[k]

    # degree-0 bases
    B = []
    for i in range(nk - 1):
        lo, hi = KNOTS[i], KNOTS[i + 1]
        if hi <= lo:
            B.append(None)  # zero-width interval -> statically zero
        elif hi >= KNOTS[-1]:
            # last non-degenerate interval is closed at the top so x == range_max
            # stays inside the spline's support (no eps hack needed)
            B.append(jnp.where((xc >= lo) & (xc <= hi), 1.0, 0.0))
        else:
            B.append(jnp.where((xc >= lo) & (xc < hi), 1.0, 0.0))

    # degree raising
    for d in range(1, DEGREE + 1):
        Bn = []
        for i in range(nk - 1 - d):
            d1 = KNOTS[i + d] - KNOTS[i]
            d2 = KNOTS[i + d + 1] - KNOTS[i + 1]
            terms = []
            if d1 > 0.0 and B[i] is not None:
                terms.append((ramp(KNOTS[i]) * (1.0 / d1)) * B[i])
            if d2 > 0.0 and B[i + 1] is not None:
                terms.append((ramp(KNOTS[i + d + 1]) * (-1.0 / d2)) * B[i + 1])
            if not terms:
                Bn.append(None)
            elif len(terms) == 1:
                Bn.append(terms[0])
            else:
                Bn.append(terms[0] + terms[1])
        B = Bn
    return B


def _bspline_apply(x, coeffs):
    """Elementwise clamped degree-DEGREE B-spline.

    `coeffs` may be a 1-D jnp array (reference path) or a 1-D SMEM Ref
    (kernel path); `coeffs[j]` is a scalar in either case, so inside the
    kernel each control point is a scalar×vector multiply (no cross-lane
    extract from a VMEM vector).
    """
    xc = jnp.clip(x, KNOTS[0], KNOTS[-1])
    basis = _bspline_basis(xc)
    out = None
    for j in range(NUM_CTRL):
        if basis[j] is None:
            continue
        term = coeffs[j] * basis[j]
        out = term if out is None else out + term
    if out is None:
        out = jnp.zeros_like(x)
    return out


# ------------------------------- kernel --------------------------------------
def kan_kernel(x_ref, wi_ref, bi_ref, wo_ref, bo_ref, c1_ref, c2_ref, o_ref):
    # x_ref:  (TB, D)                batch tile of the flattened input
    # wi_ref: (NUM_INNER, D)         inner_scales (resident across the grid)
    # bi_ref: (NUM_INNER, 1)         inner_biases as a VMEM column vector
    # wo_ref: (NUM_OUTER, NUM_INNER) outer_scales
    # bo_ref: (NUM_OUTER, 1)         outer_biases
    # c1_ref, c2_ref: (NUM_CTRL,)    spline coefficients in SMEM (scalar reads)
    # o_ref:  (NUM_OUTER, TB)        output with batch on the lane axis
    dn = (((1,), (1,)), ((), ()))  # contract the D axis of both operands
    s1 = lax.dot_general(wi_ref[...], x_ref[...], dn,
                         preferred_element_type=jnp.float32) + bi_ref[...]
    a1 = _bspline_apply(s1, c1_ref)                         # (NI, TB), lane-dense
    s2 = jnp.dot(wo_ref[...], a1,
                 preferred_element_type=jnp.float32) + bo_ref[...]
    o_ref[...] = _bspline_apply(s2, c2_ref).astype(o_ref.dtype)


def _round_up(n, m):
    return ((n + m - 1) // m) * m


@partial(jax.jit, static_argnames=("tb",))
def kan_forward(x, inner_scales, inner_biases, outer_scales, outer_biases,
                c1, c2, *, tb=2048):
    B = x.shape[0]
    xf = x.reshape(B, -1).astype(jnp.float32)   # nn.Flatten (NCHW row-major)
    D = xf.shape[1]

    # Batch tile: multiple of 128 (lane width), capped at the padded batch.
    tb = max(128, min(_round_up(tb, 128), _round_up(B, 128)))
    Bp = _round_up(B, tb)
    if Bp != B:
        xf = jnp.pad(xf, ((0, Bp - B), (0, 0)))  # zero-pad tail rows; sliced off below

    wi = inner_scales.astype(jnp.float32)                      # (NI, D)
    wo = outer_scales.astype(jnp.float32)                      # (NO, NI)
    bi = inner_biases.reshape(NUM_INNER, 1).astype(jnp.float32)
    bo = outer_biases.reshape(NUM_OUTER, 1).astype(jnp.float32)
    c1r = c1.reshape(NUM_CTRL).astype(jnp.float32)
    c2r = c2.reshape(NUM_CTRL).astype(jnp.float32)

    spline_flops_per_elem = 64  # rough VPU op count of the pruned degree-2 spline
    cost = pl.CostEstimate(
        flops=int(2 * Bp * D * NUM_INNER + 2 * Bp * NUM_INNER * NUM_OUTER
                  + Bp * (NUM_INNER + NUM_OUTER) * spline_flops_per_elem),
        transcendentals=0,
        bytes_accessed=int(4 * (Bp * D + NUM_INNER * D + NUM_OUTER * NUM_INNER
                                + NUM_INNER + NUM_OUTER + 2 * NUM_CTRL
                                + NUM_OUTER * Bp)),
    )

    out_t = pl.pallas_call(
        kan_kernel,
        out_shape=jax.ShapeDtypeStruct((NUM_OUTER, Bp), jnp.float32),
        grid=(Bp // tb,),
        in_specs=[
            pl.BlockSpec((tb, D), lambda i: (i, 0)),                 # x batch tile
            pl.BlockSpec((NUM_INNER, D), lambda i: (0, 0)),          # wi (resident)
            pl.BlockSpec((NUM_INNER, 1), lambda i: (0, 0)),          # bi
            pl.BlockSpec((NUM_OUTER, NUM_INNER), lambda i: (0, 0)),  # wo
            pl.BlockSpec((NUM_OUTER, 1), lambda i: (0, 0)),          # bo
            pl.BlockSpec(memory_space=pltpu.MemorySpace.SMEM),       # c1 (scalars)
            pl.BlockSpec(memory_space=pltpu.MemorySpace.SMEM),       # c2 (scalars)
        ],
        out_specs=pl.BlockSpec((NUM_OUTER, tb), lambda i: (0, i)),   # lane-dense out
        compiler_params=pltpu.CompilerParams(
            dimension_semantics=("parallel",),   # shard batch tiles across TCs (v7x)
            vmem_limit_bytes=32 * 1024 * 1024,
        ),
        cost_estimate=cost,
    )(xf, wi, bi, wo, bo, c1r, c2r)

    return out_t[:, :B].T                        # (B, NUM_OUTER)


# --------------------------- pure-JAX reference -------------------------------
def kan_reference(x, inner_scales, inner_biases, outer_scales, outer_biases, c1, c2):
    xf = x.reshape(x.shape[0], -1).astype(jnp.float32)
    s1 = jnp.dot(xf, inner_scales.T, precision=lax.Precision.HIGHEST) + inner_biases
    a1 = _bspline_apply(s1, c1)
    s2 = jnp.dot(a1, outer_scales.T, precision=lax.Precision.HIGHEST) + outer_biases
    return _bspline_apply(s2, c2)


# --------------------------------- main ---------------------------------------
if __name__ == "__main__":
    key = jax.random.PRNGKey(0)
    k_in, k_w1, k_w2 = jax.random.split(key, 3)

    # input: NCHW, (B=260, C=4, H=16, W=16) -> flattened dim 1024 == INPUT_DIM
    # (260 rows with tb=128 exercises multi-step grid + tail padding)
    B, C, H, W = 260, 4, 16, 16
    x = jax.random.normal(k_in, (B, C, H, W), dtype=jnp.float32)

    # parameters, deterministic init matching reset_parameters():
    #   scales ~ N(0, 0.05), biases = 0
    inner_scales = 0.05 * jax.random.normal(k_w1, (NUM_INNER, INPUT_DIM), jnp.float32)
    outer_scales = 0.05 * jax.random.normal(k_w2, (NUM_OUTER, NUM_INNER), jnp.float32)
    inner_biases = jnp.zeros((NUM_INNER,), jnp.float32)
    outer_biases = jnp.zeros((NUM_OUTER,), jnp.float32)

    # B-spline control points: Greville abscissae (spline ~ identity on range).
    knots = np.array(KNOTS, dtype=np.float32)
    greville = np.array(
        [knots[j + 1: j + 1 + DEGREE].mean() for j in range(NUM_CTRL)],
        dtype=np.float32,
    )
    c1 = jnp.asarray(greville)
    c2 = jnp.asarray(greville)

    out = kan_forward(x, inner_scales, inner_biases, outer_scales, outer_biases,
                      c1, c2, tb=128)
    out = jax.block_until_ready(out)

    ref = kan_reference(x, inner_scales, inner_biases, outer_scales, outer_biases,
                        c1, c2)
    assert out.shape == (B, NUM_OUTER)
    np.testing.assert_allclose(np.asarray(out), np.asarray(ref), rtol=5e-3, atol=5e-3)

    print("KERNEL_OK")
</pallas_src>

<mosaic_0001>
module attributes {stable_mosaic.version = 11 : i64} {
  func.func @kan_kernel(%arg0: i32, %arg1: memref<128x1024xf32, #tpu.memory_space<vmem>>, %arg2: memref<15x1024xf32, #tpu.memory_space<vmem>>, %arg3: memref<15x1xf32, #tpu.memory_space<vmem>>, %arg4: memref<19x15xf32, #tpu.memory_space<vmem>>, %arg5: memref<19x1xf32, #tpu.memory_space<vmem>>, %arg6: memref<7xf32, #tpu.memory_space<smem>>, %arg7: memref<7xf32, #tpu.memory_space<smem>>, %arg8: memref<19x128xf32, #tpu.memory_space<vmem>>) attributes {dimension_semantics = [#tpu.dimension_semantics<parallel>], iteration_bounds = array<i64: 3>, scalar_prefetch = 0 : i64, scratch_operands = 0 : i64, tpu.core_type = #tpu.core_type<tc>, window_params = [{transform_indices = @transform_0, window_bounds = array<i64: 128, 1024>}, {pipeline_mode = #tpu.pipeline_mode<synchronous>, transform_indices = @transform_1, window_bounds = array<i64: 15, 1024>}, {pipeline_mode = #tpu.pipeline_mode<synchronous>, transform_indices = @transform_2, window_bounds = array<i64: 15, 1>}, {pipeline_mode = #tpu.pipeline_mode<synchronous>, transform_indices = @transform_3, window_bounds = array<i64: 19, 15>}, {pipeline_mode = #tpu.pipeline_mode<synchronous>, transform_indices = @transform_4, window_bounds = array<i64: 19, 1>}, {transform_indices = @transform_5, window_bounds = array<i64: 7>}, {transform_indices = @transform_6, window_bounds = array<i64: 7>}, {transform_indices = @transform_7, window_bounds = array<i64: 19, 128>}]} {
    %c0 = arith.constant 0 : index
    %c0_0 = arith.constant 0 : index
    %0 = vector.load %arg2[%c0, %c0_0] : memref<15x1024xf32, #tpu.memory_space<vmem>>, vector<15x1024xf32>
    %c0_1 = arith.constant 0 : index
    %c0_2 = arith.constant 0 : index
    %1 = vector.load %arg1[%c0_1, %c0_2] : memref<128x1024xf32, #tpu.memory_space<vmem>>, vector<128x1024xf32>
    %cst = arith.constant dense<0.000000e+00> : vector<15x128xf32>
    %2 = tpu.matmul %0, %1, %cst {dimension_numbers = #tpu.dot_dimension_numbers<[1], [1], [0], [0], [0, 0, 1, 0], [], []>} : vector<15x1024xf32>, vector<128x1024xf32>, vector<15x128xf32> -> vector<15x128xf32>
    %c0_3 = arith.constant 0 : index
    %c0_4 = arith.constant 0 : index
    %3 = vector.load %arg3[%c0_3, %c0_4] : memref<15x1xf32, #tpu.memory_space<vmem>>, vector<15x1xf32>
    %4 = vector.broadcast %3 : vector<15x1xf32> to vector<15x128xf32>
    %5 = arith.addf %2, %4 : vector<15x128xf32>
    %cst_5 = arith.constant -3.401000e+00 : f32
    %cst_6 = arith.constant 3.323200e+01 : f32
    %6 = vector.broadcast %cst_5 : f32 to vector<15x128xf32>
    %7 = arith.maximumf %6, %5 : vector<15x128xf32>
    %8 = vector.broadcast %cst_6 : f32 to vector<15x128xf32>
    %9 = arith.minimumf %8, %7 : vector<15x128xf32>
    %cst_7 = arith.constant -3.401000e+00 : f32
    %10 = vector.broadcast %cst_7 : f32 to vector<15x128xf32>
    %11 = arith.cmpf oge, %9, %10 : vector<15x128xf32>
    %cst_8 = arith.constant 3.925600e+00 : f32
    %12 = vector.broadcast %cst_8 : f32 to vector<15x128xf32>
    %13 = arith.cmpf olt, %9, %12 : vector<15x128xf32>
    %14 = arith.andi %11, %13 : vector<15x128xi1>
    %cst_9 = arith.constant 1.000000e+00 : f32
    %cst_10 = arith.constant 0.000000e+00 : f32
    %15 = vector.broadcast %cst_9 : f32 to vector<15x128xf32>
    %16 = vector.broadcast %cst_10 : f32 to vector<15x128xf32>
    %17 = arith.select %14, %15, %16 : vector<15x128xi1>, vector<15x128xf32>
    %cst_11 = arith.constant 3.925600e+00 : f32
    %18 = vector.broadcast %cst_11 : f32 to vector<15x128xf32>
    %19 = arith.cmpf oge, %9, %18 : vector<15x128xf32>
    %cst_12 = arith.constant 1.125220e+01 : f32
    %20 = vector.broadcast %cst_12 : f32 to vector<15x128xf32>
    %21 = arith.cmpf olt, %9, %20 : vector<15x128xf32>
    %22 = arith.andi %19, %21 : vector<15x128xi1>
    %cst_13 = arith.constant 1.000000e+00 : f32
    %cst_14 = arith.constant 0.000000e+00 : f32
    %23 = vector.broadcast %cst_13 : f32 to vector<15x128xf32>
    %24 = vector.broadcast %cst_14 : f32 to vector<15x128xf32>
    %25 = arith.select %22, %23, %24 : vector<15x128xi1>, vector<15x128xf32>
    %cst_15 = arith.constant 1.125220e+01 : f32
    %26 = vector.broadcast %cst_15 : f32 to vector<15x128xf32>
    %27 = arith.cmpf oge, %9, %26 : vector<15x128xf32>
    %cst_16 = arith.constant 1.857880e+01 : f32
    %28 = vector.broadcast %cst_16 : f32 to vector<15x128xf32>
    %29 = arith.cmpf olt, %9, %28 : vector<15x128xf32>
    %30 = arith.andi %27, %29 : vector<15x128xi1>
    %cst_17 = arith.constant 1.000000e+00 : f32
    %cst_18 = arith.constant 0.000000e+00 : f32
    %31 = vector.broadcast %cst_17 : f32 to vector<15x128xf32>
    %32 = vector.broadcast %cst_18 : f32 to vector<15x128xf32>
    %33 = arith.select %30, %31, %32 : vector<15x128xi1>, vector<15x128xf32>
    %cst_19 = arith.constant 1.857880e+01 : f32
    %34 = vector.broadcast %cst_19 : f32 to vector<15x128xf32>
    %35 = arith.cmpf oge, %9, %34 : vector<15x128xf32>
    %cst_20 = arith.constant 2.590540e+01 : f32
    %36 = vector.broadcast %cst_20 : f32 to vector<15x128xf32>
    %37 = arith.cmpf olt, %9, %36 : vector<15x128xf32>
    %38 = arith.andi %35, %37 : vector<15x128xi1>
    %cst_21 = arith.constant 1.000000e+00 : f32
    %cst_22 = arith.constant 0.000000e+00 : f32
    %39 = vector.broadcast %cst_21 : f32 to vector<15x128xf32>
    %40 = vector.broadcast %cst_22 : f32 to vector<15x128xf32>
    %41 = arith.select %38, %39, %40 : vector<15x128xi1>, vector<15x128xf32>
    %cst_23 = arith.constant 2.590540e+01 : f32
    %42 = vector.broadcast %cst_23 : f32 to vector<15x128xf32>
    %43 = arith.cmpf oge, %9, %42 : vector<15x128xf32>
    %cst_24 = arith.constant 3.323200e+01 : f32
    %44 = vector.broadcast %cst_24 : f32 to vector<15x128xf32>
    %45 = arith.cmpf ole, %9, %44 : vector<15x128xf32>
    %46 = arith.andi %43, %45 : vector<15x128xi1>
    %cst_25 = arith.constant 1.000000e+00 : f32
    %cst_26 = arith.constant 0.000000e+00 : f32
    %47 = vector.broadcast %cst_25 : f32 to vector<15x128xf32>
    %48 = vector.broadcast %cst_26 : f32 to vector<15x128xf32>
    %49 = arith.select %46, %47, %48 : vector<15x128xi1>, vector<15x128xf32>
    %cst_27 = arith.constant 3.925600e+00 : f32
    %50 = vector.broadcast %cst_27 : f32 to vector<15x128xf32>
    %51 = arith.subf %9, %50 : vector<15x128xf32>
    %cst_28 = arith.constant -0.136488959 : f32
    %52 = vector.broadcast %cst_28 : f32 to vector<15x128xf32>
    %53 = arith.mulf %51, %52 : vector<15x128xf32>
    %54 = arith.mulf %53, %17 : vector<15x128xf32>
    %cst_29 = arith.constant -3.401000e+00 : f32
    %55 = vector.broadcast %cst_29 : f32 to vector<15x128xf32>
    %56 = arith.subf %9, %55 : vector<15x128xf32>
    %cst_30 = arith.constant 0.136488959 : f32
    %57 = vector.broadcast %cst_30 : f32 to vector<15x128xf32>
    %58 = arith.mulf %56, %57 : vector<15x128xf32>
    %59 = arith.mulf %58, %17 : vector<15x128xf32>
    %cst_31 = arith.constant 1.125220e+01 : f32
    %60 = vector.broadcast %cst_31 : f32 to vector<15x128xf32>
    %61 = arith.subf %9, %60 : vector<15x128xf32>
    %cst_32 = arith.constant -0.136488959 : f32
    %62 = vector.broadcast %cst_32 : f32 to vector<15x128xf32>
    %63 = arith.mulf %61, %62 : vector<15x128xf32>
    %64 = arith.mulf %63, %25 : vector<15x128xf32>
    %65 = arith.addf %59, %64 : vector<15x128xf32>
    %cst_33 = arith.constant 0.136488959 : f32
    %66 = vector.broadcast %cst_33 : f32 to vector<15x128xf32>
    %67 = arith.mulf %51, %66 : vector<15x128xf32>
    %68 = arith.mulf %67, %25 : vector<15x128xf32>
    %cst_34 = arith.constant 1.857880e+01 : f32
    %69 = vector.broadcast %cst_34 : f32 to vector<15x128xf32>
    %70 = arith.subf %9, %69 : vector<15x128xf32>
    %cst_35 = arith.constant -0.136488959 : f32
    %71 = vector.broadcast %cst_35 : f32 to vector<15x128xf32>
    %72 = arith.mulf %70, %71 : vector<15x128xf32>
    %73 = arith.mulf %72, %33 : vector<15x128xf32>
    %74 = arith.addf %68, %73 : vector<15x128xf32>
    %cst_36 = arith.constant 0.136488959 : f32
    %75 = vector.broadcast %cst_36 : f32 to vector<15x128xf32>
    %76 = arith.mulf %61, %75 : vector<15x128xf32>
    %77 = arith.mulf %76, %33 : vector<15x128xf32>
    %cst_37 = arith.constant 2.590540e+01 : f32
    %78 = vector.broadcast %cst_37 : f32 to vector<15x128xf32>
    %79 = arith.subf %9, %78 : vector<15x128xf32>
    %cst_38 = arith.constant -0.136488959 : f32
    %80 = vector.broadcast %cst_38 : f32 to vector<15x128xf32>
    %81 = arith.mulf %79, %80 : vector<15x128xf32>
    %82 = arith.mulf %81, %41 : vector<15x128xf32>
    %83 = arith.addf %77, %82 : vector<15x128xf32>
    %cst_39 = arith.constant 0.136488959 : f32
    %84 = vector.broadcast %cst_39 : f32 to vector<15x128xf32>
    %85 = arith.mulf %70, %84 : vector<15x128xf32>
    %86 = arith.mulf %85, %41 : vector<15x128xf32>
    %cst_40 = arith.constant 3.323200e+01 : f32
    %87 = vector.broadcast %cst_40 : f32 to vector<15x128xf32>
    %88 = arith.subf %9, %87 : vector<15x128xf32>
    %cst_41 = arith.constant -0.136488959 : f32
    %89 = vector.broadcast %cst_41 : f32 to vector<15x128xf32>
    %90 = arith.mulf %88, %89 : vector<15x128xf32>
    %91 = arith.mulf %90, %49 : vector<15x128xf32>
    %92 = arith.addf %86, %91 : vector<15x128xf32>
    %cst_42 = arith.constant 0.136488959 : f32
    %93 = vector.broadcast %cst_42 : f32 to vector<15x128xf32>
    %94 = arith.mulf %79, %93 : vector<15x128xf32>
    %95 = arith.mulf %94, %49 : vector<15x128xf32>
    %cst_43 = arith.constant -0.136488959 : f32
    %96 = vector.broadcast %cst_43 : f32 to vector<15x128xf32>
    %97 = arith.mulf %51, %96 : vector<15x128xf32>
    %98 = arith.mulf %97, %54 : vector<15x128xf32>
    %cst_44 = arith.constant 0.136488959 : f32
    %99 = vector.broadcast %cst_44 : f32 to vector<15x128xf32>
    %100 = arith.mulf %56, %99 : vector<15x128xf32>
    %101 = arith.mulf %100, %54 : vector<15x128xf32>
    %cst_45 = arith.constant -0.0682444796 : f32
    %102 = vector.broadcast %cst_45 : f32 to vector<15x128xf32>
    %103 = arith.mulf %61, %102 : vector<15x128xf32>
    %104 = arith.mulf %103, %65 : vector<15x128xf32>
    %105 = arith.addf %101, %104 : vector<15x128xf32>
    %cst_46 = arith.constant 0.0682444796 : f32
    %106 = vector.broadcast %cst_46 : f32 to vector<15x128xf32>
    %107 = arith.mulf %56, %106 : vector<15x128xf32>
    %108 = arith.mulf %107, %65 : vector<15x128xf32>
    %cst_47 = arith.constant -0.0682444796 : f32
    %109 = vector.broadcast %cst_47 : f32 to vector<15x128xf32>
    %110 = arith.mulf %70, %109 : vector<15x128xf32>
    %111 = arith.mulf %110, %74 : vector<15x128xf32>
    %112 = arith.addf %108, %111 : vector<15x128xf32>
    %cst_48 = arith.constant 0.0682444796 : f32
    %113 = vector.broadcast %cst_48 : f32 to vector<15x128xf32>
    %114 = arith.mulf %51, %113 : vector<15x128xf32>
    %115 = arith.mulf %114, %74 : vector<15x128xf32>
    %cst_49 = arith.constant -0.0682444796 : f32
    %116 = vector.broadcast %cst_49 : f32 to vector<15x128xf32>
    %117 = arith.mulf %79, %116 : vector<15x128xf32>
    %118 = arith.mulf %117, %83 : vector<15x128xf32>
    %119 = arith.addf %115, %118 : vector<15x128xf32>
    %cst_50 = arith.constant 0.0682444796 : f32
    %120 = vector.broadcast %cst_50 : f32 to vector<15x128xf32>
    %121 = arith.mulf %61, %120 : vector<15x128xf32>
    %122 = arith.mulf %121, %83 : vector<15x128xf32>
    %cst_51 = arith.constant -0.0682444796 : f32
    %123 = vector.broadcast %cst_51 : f32 to vector<15x128xf32>
    %124 = arith.mulf %88, %123 : vector<15x128xf32>
    %125 = arith.mulf %124, %92 : vector<15x128xf32>
    %126 = arith.addf %122, %125 : vector<15x128xf32>
    %cst_52 = arith.constant 0.0682444796 : f32
    %127 = vector.broadcast %cst_52 : f32 to vector<15x128xf32>
    %128 = arith.mulf %70, %127 : vector<15x128xf32>
    %129 = arith.mulf %128, %92 : vector<15x128xf32>
    %cst_53 = arith.constant -0.136488959 : f32
    %130 = vector.broadcast %cst_53 : f32 to vector<15x128xf32>
    %131 = arith.mulf %88, %130 : vector<15x128xf32>
    %132 = arith.mulf %131, %95 : vector<15x128xf32>
    %133 = arith.addf %129, %132 : vector<15x128xf32>
    %cst_54 = arith.constant 0.136488959 : f32
    %134 = vector.broadcast %cst_54 : f32 to vector<15x128xf32>
    %135 = arith.mulf %79, %134 : vector<15x128xf32>
    %136 = arith.mulf %135, %95 : vector<15x128xf32>
    %c0_55 = arith.constant 0 : index
    %137 = memref.load %arg6[%c0_55] : memref<7xf32, #tpu.memory_space<smem>>
    %138 = vector.broadcast %137 : f32 to vector<15x128xf32>
    %139 = arith.mulf %138, %98 : vector<15x128xf32>
    %c1 = arith.constant 1 : index
    %140 = memref.load %arg6[%c1] : memref<7xf32, #tpu.memory_space<smem>>
    %141 = vector.broadcast %140 : f32 to vector<15x128xf32>
    %142 = arith.mulf %141, %105 : vector<15x128xf32>
    %143 = arith.addf %139, %142 : vector<15x128xf32>
    %c2 = arith.constant 2 : index
    %144 = memref.load %arg6[%c2] : memref<7xf32, #tpu.memory_space<smem>>
    %145 = vector.broadcast %144 : f32 to vector<15x128xf32>
    %146 = arith.mulf %145, %112 : vector<15x128xf32>
    %147 = arith.addf %143, %146 : vector<15x128xf32>
    %c3 = arith.constant 3 : index
    %148 = memref.load %arg6[%c3] : memref<7xf32, #tpu.memory_space<smem>>
    %149 = vector.broadcast %148 : f32 to vector<15x128xf32>
    %150 = arith.mulf %149, %119 : vector<15x128xf32>
    %151 = arith.addf %147, %150 : vector<15x128xf32>
    %c4 = arith.constant 4 : index
    %152 = memref.load %arg6[%c4] : memref<7xf32, #tpu.memory_space<smem>>
    %153 = vector.broadcast %152 : f32 to vector<15x128xf32>
    %154 = arith.mulf %153, %126 : vector<15x128xf32>
    %155 = arith.addf %151, %154 : vector<15x128xf32>
    %c5 = arith.constant 5 : index
    %156 = memref.load %arg6[%c5] : memref<7xf32, #tpu.memory_space<smem>>
    %157 = vector.broadcast %156 : f32 to vector<15x128xf32>
    %158 = arith.mulf %157, %133 : vector<15x128xf32>
    %159 = arith.addf %155, %158 : vector<15x128xf32>
    %c6 = arith.constant 6 : index
    %160 = memref.load %arg6[%c6] : memref<7xf32, #tpu.memory_space<smem>>
    %161 = vector.broadcast %160 : f32 to vector<15x128xf32>
    %162 = arith.mulf %161, %136 : vector<15x128xf32>
    %163 = arith.addf %159, %162 : vector<15x128xf32>
    %c0_56 = arith.constant 0 : index
    %c0_57 = arith.constant 0 : index
    %164 = vector.load %arg4[%c0_56, %c0_57] : memref<19x15xf32, #tpu.memory_space<vmem>>, vector<19x15xf32>
    %cst_58 = arith.constant dense<0.000000e+00> : vector<19x128xf32>
    %165 = tpu.matmul %164, %163, %cst_58 {dimension_numbers = #tpu.dot_dimension_numbers<[1], [0], [0], [1], [0, 0, 1, 1], [], []>} : vector<19x15xf32>, vector<15x128xf32>, vector<19x128xf32> -> vector<19x128xf32>
    %c0_59 = arith.constant 0 : index
    %c0_60 = arith.constant 0 : index
    %166 = vector.load %arg5[%c0_59, %c0_60] : memref<19x1xf32, #tpu.memory_space<vmem>>, vector<19x1xf32>
    %167 = vector.broadcast %166 : vector<19x1xf32> to vector<19x128xf32>
    %168 = arith.addf %165, %167 : vector<19x128xf32>
    %cst_61 = arith.constant -3.401000e+00 : f32
    %cst_62 = arith.constant 3.323200e+01 : f32
    %169 = vector.broadcast %cst_61 : f32 to vector<19x128xf32>
    %170 = arith.maximumf %169, %168 : vector<19x128xf32>
    %171 = vector.broadcast %cst_62 : f32 to vector<19x128xf32>
    %172 = arith.minimumf %171, %170 : vector<19x128xf32>
    %cst_63 = arith.constant -3.401000e+00 : f32
    %173 = vector.broadcast %cst_63 : f32 to vector<19x128xf32>
    %174 = arith.cmpf oge, %172, %173 : vector<19x128xf32>
    %cst_64 = arith.constant 3.925600e+00 : f32
    %175 = vector.broadcast %cst_64 : f32 to vector<19x128xf32>
    %176 = arith.cmpf olt, %172, %175 : vector<19x128xf32>
    %177 = arith.andi %174, %176 : vector<19x128xi1>
    %cst_65 = arith.constant 1.000000e+00 : f32
    %cst_66 = arith.constant 0.000000e+00 : f32
    %178 = vector.broadcast %cst_65 : f32 to vector<19x128xf32>
    %179 = vector.broadcast %cst_66 : f32 to vector<19x128xf32>
    %180 = arith.select %177, %178, %179 : vector<19x128xi1>, vector<19x128xf32>
    %cst_67 = arith.constant 3.925600e+00 : f32
    %181 = vector.broadcast %cst_67 : f32 to vector<19x128xf32>
    %182 = arith.cmpf oge, %172, %181 : vector<19x128xf32>
    %cst_68 = arith.constant 1.125220e+01 : f32
    %183 = vector.broadcast %cst_68 : f32 to vector<19x128xf32>
    %184 = arith.cmpf olt, %172, %183 : vector<19x128xf32>
    %185 = arith.andi %182, %184 : vector<19x128xi1>
    %cst_69 = arith.constant 1.000000e+00 : f32
    %cst_70 = arith.constant 0.000000e+00 : f32
    %186 = vector.broadcast %cst_69 : f32 to vector<19x128xf32>
    %187 = vector.broadcast %cst_70 : f32 to vector<19x128xf32>
    %188 = arith.select %185, %186, %187 : vector<19x128xi1>, vector<19x128xf32>
    %cst_71 = arith.constant 1.125220e+01 : f32
    %189 = vector.broadcast %cst_71 : f32 to vector<19x128xf32>
    %190 = arith.cmpf oge, %172, %189 : vector<19x128xf32>
    %cst_72 = arith.constant 1.857880e+01 : f32
    %191 = vector.broadcast %cst_72 : f32 to vector<19x128xf32>
    %192 = arith.cmpf olt, %172, %191 : vector<19x128xf32>
    %193 = arith.andi %190, %192 : vector<19x128xi1>
    %cst_73 = arith.constant 1.000000e+00 : f32
    %cst_74 = arith.constant 0.000000e+00 : f32
    %194 = vector.broadcast %cst_73 : f32 to vector<19x128xf32>
    %195 = vector.broadcast %cst_74 : f32 to vector<19x128xf32>
    %196 = arith.select %193, %194, %195 : vector<19x128xi1>, vector<19x128xf32>
    %cst_75 = arith.constant 1.857880e+01 : f32
    %197 = vector.broadcast %cst_75 : f32 to vector<19x128xf32>
    %198 = arith.cmpf oge, %172, %197 : vector<19x128xf32>
    %cst_76 = arith.constant 2.590540e+01 : f32
    %199 = vector.broadcast %cst_76 : f32 to vector<19x128xf32>
    %200 = arith.cmpf olt, %172, %199 : vector<19x128xf32>
    %201 = arith.andi %198, %200 : vector<19x128xi1>
    %cst_77 = arith.constant 1.000000e+00 : f32
    %cst_78 = arith.constant 0.000000e+00 : f32
    %202 = vector.broadcast %cst_77 : f32 to vector<19x128xf32>
    %203 = vector.broadcast %cst_78 : f32 to vector<19x128xf32>
    %204 = arith.select %201, %202, %203 : vector<19x128xi1>, vector<19x128xf32>
    %cst_79 = arith.constant 2.590540e+01 : f32
    %205 = vector.broadcast %cst_79 : f32 to vector<19x128xf32>
    %206 = arith.cmpf oge, %172, %205 : vector<19x128xf32>
    %cst_80 = arith.constant 3.323200e+01 : f32
    %207 = vector.broadcast %cst_80 : f32 to vector<19x128xf32>
    %208 = arith.cmpf ole, %172, %207 : vector<19x128xf32>
    %209 = arith.andi %206, %208 : vector<19x128xi1>
    %cst_81 = arith.constant 1.000000e+00 : f32
    %cst_82 = arith.constant 0.000000e+00 : f32
    %210 = vector.broadcast %cst_81 : f32 to vector<19x128xf32>
    %211 = vector.broadcast %cst_82 : f32 to vector<19x128xf32>
    %212 = arith.select %209, %210, %211 : vector<19x128xi1>, vector<19x128xf32>
    %cst_83 = arith.constant 3.925600e+00 : f32
    %213 = vector.broadcast %cst_83 : f32 to vector<19x128xf32>
    %214 = arith.subf %172, %213 : vector<19x128xf32>
    %cst_84 = arith.constant -0.136488959 : f32
    %215 = vector.broadcast %cst_84 : f32 to vector<19x128xf32>
    %216 = arith.mulf %214, %215 : vector<19x128xf32>
    %217 = arith.mulf %216, %180 : vector<19x128xf32>
    %cst_85 = arith.constant -3.401000e+00 : f32
    %218 = vector.broadcast %cst_85 : f32 to vector<19x128xf32>
    %219 = arith.subf %172, %218 : vector<19x128xf32>
    %cst_86 = arith.constant 0.136488959 : f32
    %220 = vector.broadcast %cst_86 : f32 to vector<19x128xf32>
    %221 = arith.mulf %219, %220 : vector<19x128xf32>
    %222 = arith.mulf %221, %180 : vector<19x128xf32>
    %cst_87 = arith.constant 1.125220e+01 : f32
    %223 = vector.broadcast %cst_87 : f32 to vector<19x128xf32>
    %224 = arith.subf %172, %223 : vector<19x128xf32>
    %cst_88 = arith.constant -0.136488959 : f32
    %225 = vector.broadcast %cst_88 : f32 to vector<19x128xf32>
    %226 = arith.mulf %224, %225 : vector<19x128xf32>
    %227 = arith.mulf %226, %188 : vector<19x128xf32>
    %228 = arith.addf %222, %227 : vector<19x128xf32>
    %cst_89 = arith.constant 0.136488959 : f32
    %229 = vector.broadcast %cst_89 : f32 to vector<19x128xf32>
    %230 = arith.mulf %214, %229 : vector<19x128xf32>
    %231 = arith.mulf %230, %188 : vector<19x128xf32>
    %cst_90 = arith.constant 1.857880e+01 : f32
    %232 = vector.broadcast %cst_90 : f32 to vector<19x128xf32>
    %233 = arith.subf %172, %232 : vector<19x128xf32>
    %cst_91 = arith.constant -0.136488959 : f32
    %234 = vector.broadcast %cst_91 : f32 to vector<19x128xf32>
    %235 = arith.mulf %233, %234 : vector<19x128xf32>
    %236 = arith.mulf %235, %196 : vector<19x128xf32>
    %237 = arith.addf %231, %236 : vector<19x128xf32>
    %cst_92 = arith.constant 0.136488959 : f32
    %238 = vector.broadcast %cst_92 : f32 to vector<19x128xf32>
    %239 = arith.mulf %224, %238 : vector<19x128xf32>
    %240 = arith.mulf %239, %196 : vector<19x128xf32>
    %cst_93 = arith.constant 2.590540e+01 : f32
    %241 = vector.broadcast %cst_93 : f32 to vector<19x128xf32>
    %242 = arith.subf %172, %241 : vector<19x128xf32>
    %cst_94 = arith.constant -0.136488959 : f32
    %243 = vector.broadcast %cst_94 : f32 to vector<19x128xf32>
    %244 = arith.mulf %242, %243 : vector<19x128xf32>
    %245 = arith.mulf %244, %204 : vector<19x128xf32>
    %246 = arith.addf %240, %245 : vector<19x128xf32>
    %cst_95 = arith.constant 0.136488959 : f32
    %247 = vector.broadcast %cst_95 : f32 to vector<19x128xf32>
    %248 = arith.mulf %233, %247 : vector<19x128xf32>
    %249 = arith.mulf %248, %204 : vector<19x128xf32>
    %cst_96 = arith.constant 3.323200e+01 : f32
    %250 = vector.broadcast %cst_96 : f32 to vector<19x128xf32>
    %251 = arith.subf %172, %250 : vector<19x128xf32>
    %cst_97 = arith.constant -0.136488959 : f32
    %252 = vector.broadcast %cst_97 : f32 to vector<19x128xf32>
    %253 = arith.mulf %251, %252 : vector<19x128xf32>
    %254 = arith.mulf %253, %212 : vector<19x128xf32>
    %255 = arith.addf %249, %254 : vector<19x128xf32>
    %cst_98 = arith.constant 0.136488959 : f32
    %256 = vector.broadcast %cst_98 : f32 to vector<19x128xf32>
    %257 = arith.mulf %242, %256 : vector<19x128xf32>
    %258 = arith.mulf %257, %212 : vector<19x128xf32>
    %cst_99 = arith.constant -0.136488959 : f32
    %259 = vector.broadcast %cst_99 : f32 to vector<19x128xf32>
    %260 = arith.mulf %214, %259 : vector<19x128xf32>
    %261 = arith.mulf %260, %217 : vector<19x128xf32>
    %cst_100 = arith.constant 0.136488959 : f32
    %262 = vector.broadcast %cst_100 : f32 to vector<19x128xf32>
    %263 = arith.mulf %219, %262 : vector<19x128xf32>
    %264 = arith.mulf %263, %217 : vector<19x128xf32>
    %cst_101 = arith.constant -0.0682444796 : f32
    %265 = vector.broadcast %cst_101 : f32 to vector<19x128xf32>
    %266 = arith.mulf %224, %265 : vector<19x128xf32>
    %267 = arith.mulf %266, %228 : vector<19x128xf32>
    %268 = arith.addf %264, %267 : vector<19x128xf32>
    %cst_102 = arith.constant 0.0682444796 : f32
    %269 = vector.broadcast %cst_102 : f32 to vector<19x128xf32>
    %270 = arith.mulf %219, %269 : vector<19x128xf32>
    %271 = arith.mulf %270, %228 : vector<19x128xf32>
    %cst_103 = arith.constant -0.0682444796 : f32
    %272 = vector.broadcast %cst_103 : f32 to vector<19x128xf32>
    %273 = arith.mulf %233, %272 : vector<19x128xf32>
    %274 = arith.mulf %273, %237 : vector<19x128xf32>
    %275 = arith.addf %271, %274 : vector<19x128xf32>
    %cst_104 = arith.constant 0.0682444796 : f32
    %276 = vector.broadcast %cst_104 : f32 to vector<19x128xf32>
    %277 = arith.mulf %214, %276 : vector<19x128xf32>
    %278 = arith.mulf %277, %237 : vector<19x128xf32>
    %cst_105 = arith.constant -0.0682444796 : f32
    %279 = vector.broadcast %cst_105 : f32 to vector<19x128xf32>
    %280 = arith.mulf %242, %279 : vector<19x128xf32>
    %281 = arith.mulf %280, %246 : vector<19x128xf32>
    %282 = arith.addf %278, %281 : vector<19x128xf32>
    %cst_106 = arith.constant 0.0682444796 : f32
    %283 = vector.broadcast %cst_106 : f32 to vector<19x128xf32>
    %284 = arith.mulf %224, %283 : vector<19x128xf32>
    %285 = arith.mulf %284, %246 : vector<19x128xf32>
    %cst_107 = arith.constant -0.0682444796 : f32
    %286 = vector.broadcast %cst_107 : f32 to vector<19x128xf32>
    %287 = arith.mulf %251, %286 : vector<19x128xf32>
    %288 = arith.mulf %287, %255 : vector<19x128xf32>
    %289 = arith.addf %285, %288 : vector<19x128xf32>
    %cst_108 = arith.constant 0.0682444796 : f32
    %290 = vector.broadcast %cst_108 : f32 to vector<19x128xf32>
    %291 = arith.mulf %233, %290 : vector<19x128xf32>
    %292 = arith.mulf %291, %255 : vector<19x128xf32>
    %cst_109 = arith.constant -0.136488959 : f32
    %293 = vector.broadcast %cst_109 : f32 to vector<19x128xf32>
    %294 = arith.mulf %251, %293 : vector<19x128xf32>
    %295 = arith.mulf %294, %258 : vector<19x128xf32>
    %296 = arith.addf %292, %295 : vector<19x128xf32>
    %cst_110 = arith.constant 0.136488959 : f32
    %297 = vector.broadcast %cst_110 : f32 to vector<19x128xf32>
    %298 = arith.mulf %242, %297 : vector<19x128xf32>
    %299 = arith.mulf %298, %258 : vector<19x128xf32>
    %c0_111 = arith.constant 0 : index
    %300 = memref.load %arg7[%c0_111] : memref<7xf32, #tpu.memory_space<smem>>
    %301 = vector.broadcast %300 : f32 to vector<19x128xf32>
    %302 = arith.mulf %301, %261 : vector<19x128xf32>
    %c1_112 = arith.constant 1 : index
    %303 = memref.load %arg7[%c1_112] : memref<7xf32, #tpu.memory_space<smem>>
    %304 = vector.broadcast %303 : f32 to vector<19x128xf32>
    %305 = arith.mulf %304, %268 : vector<19x128xf32>
    %306 = arith.addf %302, %305 : vector<19x128xf32>
    %c2_113 = arith.constant 2 : index
    %307 = memref.load %arg7[%c2_113] : memref<7xf32, #tpu.memory_space<smem>>
    %308 = vector.broadcast %307 : f32 to vector<19x128xf32>
    %309 = arith.mulf %308, %275 : vector<19x128xf32>
    %310 = arith.addf %306, %309 : vector<19x128xf32>
    %c3_114 = arith.constant 3 : index
    %311 = memref.load %arg7[%c3_114] : memref<7xf32, #tpu.memory_space<smem>>
    %312 = vector.broadcast %311 : f32 to vector<19x128xf32>
    %313 = arith.mulf %312, %282 : vector<19x128xf32>
    %314 = arith.addf %310, %313 : vector<19x128xf32>
    %c4_115 = arith.constant 4 : index
    %315 = memref.load %arg7[%c4_115] : memref<7xf32, #tpu.memory_space<smem>>
    %316 = vector.broadcast %315 : f32 to vector<19x128xf32>
    %317 = arith.mulf %316, %289 : vector<19x128xf32>
    %318 = arith.addf %314, %317 : vector<19x128xf32>
    %c5_116 = arith.constant 5 : index
    %319 = memref.load %arg7[%c5_116] : memref<7xf32, #tpu.memory_space<smem>>
    %320 = vector.broadcast %319 : f32 to vector<19x128xf32>
    %321 = arith.mulf %320, %296 : vector<19x128xf32>
    %322 = arith.addf %318, %321 : vector<19x128xf32>
    %c6_117 = arith.constant 6 : index
    %323 = memref.load %arg7[%c6_117] : memref<7xf32, #tpu.memory_space<smem>>
    %324 = vector.broadcast %323 : f32 to vector<19x128xf32>
    %325 = arith.mulf %324, %299 : vector<19x128xf32>
    %326 = arith.addf %322, %325 : vector<19x128xf32>
    %c0_118 = arith.constant 0 : index
    %c0_119 = arith.constant 0 : index
    %327 = vector.load %arg8[%c0_118, %c0_119] : memref<19x128xf32, #tpu.memory_space<vmem>>, vector<19x128xf32>
    tpu.vector_store %arg8[%c0_118, %c0_119], %326 {strides = array<i32>} : memref<19x128xf32, #tpu.memory_space<vmem>>, vector<19x128xf32>,
    return
  }
  func.func @transform_0(%arg0: i32) -> (i32, i32) {
    %c0_i32 = arith.constant 0 : i32
    %c0_i32_0 = arith.constant 0 : i32
    return %arg0, %c0_i32 : i32, i32
  }
  func.func @transform_1(%arg0: i32) -> (i32, i32) {
    %c0_i32 = arith.constant 0 : i32
    %c0_i32_0 = arith.constant 0 : i32
    %c0_i32_1 = arith.constant 0 : i32
    return %c0_i32, %c0_i32_0 : i32, i32
  }
  func.func @transform_2(%arg0: i32) -> (i32, i32) {
    %c0_i32 = arith.constant 0 : i32
    %c0_i32_0 = arith.constant 0 : i32
    %c0_i32_1 = arith.constant 0 : i32
    return %c0_i32, %c0_i32_0 : i32, i32
  }
  func.func @transform_3(%arg0: i32) -> (i32, i32) {
    %c0_i32 = arith.constant 0 : i32
    %c0_i32_0 = arith.constant 0 : i32
    %c0_i32_1 = arith.constant 0 : i32
    return %c0_i32, %c0_i32_0 : i32, i32
  }
  func.func @transform_4(%arg0: i32) -> (i32, i32) {
    %c0_i32 = arith.constant 0 : i32
    %c0_i32_0 = arith.constant 0 : i32
    %c0_i32_1 = arith.constant 0 : i32
    return %c0_i32, %c0_i32_0 : i32, i32
  }
  func.func @transform_5(%arg0: i32) -> i32 {
    %c0_i32 = arith.constant 0 : i32
    %c0_i32_0 = arith.constant 0 : i32
    return %c0_i32 : i32
  }
  func.func @transform_6(%arg0: i32) -> i32 {
    %c0_i32 = arith.constant 0 : i32
    %c0_i32_0 = arith.constant 0 : i32
    return %c0_i32 : i32
  }
  func.func @transform_7(%arg0: i32) -> (i32, i32) {
    %c0_i32 = arith.constant 0 : i32
    %c0_i32_0 = arith.constant 0 : i32
    return %c0_i32, %arg0 : i32, i32
  }
}

</mosaic_0001>

<bundles_post_ra>
// kernel: kan_forward.1
= control target key start
LH: loop header
LB: loop body
LE: loop exit
PB: predicated region body
PF: predicated region fallthrough
CT: control target
= control target key end

     0   :  { %12 = vsyncpa [#allocation3], 0  ;;  %s2443_s0 = inlined_call_operand.vmem [shape: f32[384,1024], index: 0, kind: input, shape index: {}]   ;;  %s2444_s1 = inlined_call_operand.vmem [shape: f32[15,1024], index: 1, kind: input, shape index: {}]   ;;  %s2445_s2 = inlined_call_operand.vmem [shape: f32[15,1], index: 2, kind: input, shape index: {}]   ;;  %s2446_s3 = inlined_call_operand.vmem [shape: f32[19,15], index: 3, kind: input, shape index: {}]   ;;  %s2447_s4 = inlined_call_operand.vmem [shape: f32[19,1], index: 4, kind: input, shape index: {}]   ;;  %s2448_s5 = inlined_call_operand.vmem [shape: f32[7], index: 5, kind: input, shape index: {}]   ;;  %s2449_s6 = inlined_call_operand.vmem [shape: f32[7], index: 6, kind: input, shape index: {}]   ;;  %s2450_s7 = inlined_call_operand.vmem [shape: f32[19,384], index: 7, kind: output, shape index: {}]  }
   0x1   :  { %13 = vsyncpa [#allocation5], 0  ;;  %s1866_s24 = smov 0   ;;  %s1868_s25 = smov 0  }
   0x2   :  { %s1870_s26 = smov 0  }
   0x3 LB: > { %s1879_s27 = sadd.s32 4294967295, %s1817_s26   ;;  %s1881_s28 = sadd.s32 1, %s1817_s26   ;;  %s1817_s26 = sphi %s1870_s26, %s2480_s26   ;;  %s1813_s25 = sphi %s1868_s25, %s2479_s25   ;;  %s1809_s24 = sphi %s1866_s24, %s2478_s24  }
   0x4   : > { %s175_s29 = ssub.s32 %s1817_s26, %s1881_s28  ;;  %s178_s30 = sadd.s32 1, %s1813_s25 }
   0x5   : > { %p176_p0 = scmp.eq.s32.totalorder %s175_s29, 0  ;;  %p188_p1 = scmp.ne.s32.totalorder %s1813_s25, %s1809_s24 }
   0x6   : > { %p189_p2 = scmp.eq.s32.totalorder %s1879_s27, 2  ;;  %p1480_p3 = scmp.ge.s32.totalorder %s1817_s26, 1 }
   0x7   : > { %s1889_s8 = scalar_select %p176_p0, %s1813_s25, %s178_s30  }
   0x8   : > { %p1891_p4 = por %p189_p2, %p188_p1  ;;  %p202_p5 = scmp.lt.s32.totalorder %s1817_s26, 4 }
   0x9   : > { %p2451_p6 = scmp.eq.s32.totalorder %s1879_s27, 0  ;;  %s227_s13 = sshll.u32 %s2448_s5, 4  ;;  %s228_s13 = int_to_ptr.vmem [resolvable:$true] %s227_s13 }
   0xa   : > { %s2454_s9 = scalar_select %p1891_p4, 1, 0 }
   0xb   : > { %p1896_p7 = pnand %p1480_p3, %p202_p5  ;;  %s238_s16 = sshll.u32 %s2449_s6, 4  ;;  %s239_s16 = int_to_ptr.vmem [resolvable:$true] %s238_s16 }
   0xc   : > { %s1757_s18 = scalar_lea.vmem %s228_s13, 16  ;;  %p1765_p0 = scmp.lt.s32.totalorder %s228_s13, %s228_s13 }
   0xd   : > { %s2455_s10 = scalar_select %p1896_p7, 1, 0 }
   0xe   : > { %p1713_p8 = pneg %p1896_p7  ;;  %p1758_p10 = scmp.ne.s32.totalorder %s228_s13, %s1757_s18 }
   0xf   : > { %p1766_p1 = scmp.lt.s32.totalorder %s1757_s18, %s1757_s18 }
  0x10   : > { %p1910_p9 = pnand %p2451_p6, %p1713_p8 }
  0x11   : > { %p1767_p2 = por %p1766_p1, %p1765_p0 }
  0x12   : > { %p1759_p11 = pneg %p1910_p9 }
  0x14   : > { %p1760_p12 = pnand %p1759_p11, %p1758_p10 }
  0x16   : > { %p1761_p13 = pneg %p1760_p12 }
  0x18   : > { %p1768_p3 = pnand %p1767_p2, %p1761_p13 }
  0x1a   : > { %1771 = shalt.err (!%p1768_p3)
}
  0x1b   : > { %s1819_s19 = smov [#allocation2]   ;;  %s1772_s20 = scalar_lea.vmem %s239_s16, 16 }
  0x1c   : > { %1716 = dma.vmem_to_smem (!%p1910_p9), %s228_s13, 16, %s1819_s19, [#allocation3]  }
  0x1d   : > { %p1773_p5 = scmp.ne.s32.totalorder %s239_s16, %s1772_s20  ;;  %p1780_p4 = scmp.lt.s32.totalorder %s239_s16, %s239_s16 }
  0x1e   : > { %p1781_p7 = scmp.lt.s32.totalorder %s1772_s20, %s1772_s20 }
  0x1f   : > { %p1775_p8 = pnand %p1773_p5, %p1759_p11 }
  0x20   : > { %p1782_p10 = por %p1781_p7, %p1780_p4 }
  0x21   : > { %p1776_p6 = pneg %p1775_p8 }
  0x23   : > { %p1783_p12 = pnand %p1782_p10, %p1776_p6 }
  0x25   : > { %1786 = shalt.err (!%p1783_p12)
}
  0x26   : > { %s1820_s21 = smov [#allocation4]   ;;  %p2457_p13 = scmp.ne.s32.totalorder %s2455_s10, 0 }
  0x27   : > { %1719 = dma.vmem_to_smem (!%p1910_p9), %s239_s16, 16, %s1820_s21, [#allocation5]  }
  0x28   : > { %261 = sbr.rel (%p2457_p13) target bundleno = 769 (0x301), region = 48  ;;  %p2458_p0 = scmp.eq.s32.totalorder (!%p2457_p13), %s1879_s27, 0 }
  0x2f   : > { %1800 = dma.done.wait (%p2458_p0), [#allocation3], 16   ;;  %p2459_p1 = pmov %p2458_p0 }
  0x30   : > { %p2460_p11 = pmov %p2458_p0 }
  0x31   : > { %1802 = vsyncadd (%p2459_p1), [#allocation3], 4294967280 }
  0x32   : > { %1804 = dma.done.wait (%p2460_p11), [#allocation5], 16   ;;  %p2461_p4 = pmov %p2458_p0 }
  0x34   : > { %1806 = vsyncadd (%p2461_p4), [#allocation5], 4294967280 }
  0x35   : > { %271 = sfence }
  0x36   : > { %s1487_s22 = sshll.u32 %s1879_s27, 4  ;;  %v306_v0 = vld [vmem:[%s2444_s1 + $0x8] sm:$0xff]  ;;  %v1821_v31 = vmov 0   ;;  %vm2453_vm0 = vmmov 0   ;;  %s2151_s19 = sld [smem:[#allocation2]] }
  0x37   : > { %v310_v1 = vld [vmem:[%s2444_s1 + $0x28] sm:$0xff]  ;;  %p299_p6 = scmp.lt.s32.totalorder %s1487_s22, 47  ;;  %525 = vmatprep.mubr.f32.mxu1 %v306_v0  ;;  %1755 = vset.pattern.permute.xlu0 %v1821_v31  ;;  %s2169_s20 = sld [smem:[#allocation2 + $0x1]] }
  0x38   : > { %675 = vmatprep.mubr.f32.mxu0 %v310_v1  ;;  %1756 = vset.pattern.permute.xlu1 %v1821_v31  ;;  %v960_v31 = vld [vmem:[%s2447_s4 + $0x10] sm:$0x7]  ;;  %s2176_s21 = sld [smem:[#allocation2 + $0x2]]  ;;  %s2194_s23 = sld [smem:[#allocation2 + $0x4]] }
  0x39   : > { %s2482_s22 = smov (!%p299_p6, %s1487_s22), 47  ;;  %s2290_s26 = sld [smem:[#allocation2 + $0x5]] }
  0x3a   : > { %s1539_s10 = sshll.u32 %s2482_s22, 6  ;;  %s2179_s22 = sld [smem:[#allocation2 + $0x3]] }
  0x3b   : > { %s1940_s13 = scalar_lea.vmem %s2443_s0, %s1539_s10  ;;  %s2298_s29 = sld [smem:[#allocation2 + $0x6]] }
  0x3c   : > { %v322_v2 = vld [vmem:[%s1940_s13 + $0x8] sm:$0xff]  ;;  %v321_v7 = vld [vmem:[%s1940_s13] sm:$0xff]  ;;  %s1301_s15 = sld [smem:[#allocation4]]  ;;  %s1530_s16 = sld [smem:[#allocation4 + $0x1]] }
  0x3d   : > { %v330_v3 = vld [vmem:[%s1940_s13 + $0x48] sm:$0xff]  ;;  %v329_v8 = vld [vmem:[%s1940_s13 + $0x40] sm:$0xff]  ;;  %s1535_s17 = sld [smem:[#allocation4 + $0x6]]  ;;  %s1531_s18 = sld [smem:[#allocation4 + $0x2]] }
  0x3e   : > { %v326_v4 = vld [vmem:[%s1940_s13 + $0x28] sm:$0xff]  ;;  %v1558_v5 = vpack.c.bf16 %v330_v3, %v322_v2  ;;  %v1560_v10 = vpack.c.bf16 %v329_v8, %v321_v7  ;;  %v325_v11 = vld [vmem:[%s1940_s13 + $0x20] sm:$0xff]  ;;  %p2477_p7 = scmp.ne.s32.totalorder %s2454_s9, 0 }
  0x3f   : > { %v334_v6 = vld [vmem:[%s1940_s13 + $0x68] sm:$0xff]  ;;  %v333_v12 = vld [vmem:[%s1940_s13 + $0x60] sm:$0xff] }
  0x40   : > { %v1622_v9 = vpack.c.bf16 %v334_v6, %v326_v4  ;;  %v338_v13 = vld [vmem:[%s1940_s13 + $0x88] sm:$0xff]  ;;  %1559 = vmatprep.subr.bf16.mxu1 %v1558_v5  ;;  %v1624_v14 = vpack.c.bf16 %v333_v12, %v325_v11  ;;  %v337_v20 = vld [vmem:[%s1940_s13 + $0x80] sm:$0xff] }
  0x41   : > { %v346_v15 = vld [vmem:[%s1940_s13 + $0xc8] sm:$0xff]  ;;  %1561 = vmatpush1.bf16.xpose.msra.mxu1 %v1560_v10  ;;  %v345_v21 = vld [vmem:[%s1940_s13 + $0xc0] sm:$0xff] }
  0x42   : > { %v342_v16 = vld [vmem:[%s1940_s13 + $0xa8] sm:$0xff]  ;;  %1623 = vmatprep.subr.bf16.mxu0 %v1622_v9  ;;  %v1562_v18 = vpack.c.bf16 %v346_v15, %v338_v13  ;;  %v341_v22 = vld [vmem:[%s1940_s13 + $0xa0] sm:$0xff]  ;;  %v1564_v28 = vpack.c.bf16 %v345_v21, %v337_v20 }
  0x43   : > { %v350_v17 = vld [vmem:[%s1940_s13 + $0xe8] sm:$0xff]  ;;  %1625 = vmatpush1.bf16.xpose.msra.mxu0 %v1624_v14  ;;  %v349_v23 = vld [vmem:[%s1940_s13 + $0xe0] sm:$0xff] }
  0x44   : > { %v1626_v19 = vpack.c.bf16 %v350_v17, %v342_v16  ;;  %1563 = vmatprep.subr.bf16.mxu1 %v1562_v18  ;;  %v354_v24 = vld [vmem:[%s1940_s13 + $0x108] sm:$0xff]  ;;  %v1628_v29 = vpack.c.bf16 %v349_v23, %v341_v22  ;;  %v353_v33 = vld [vmem:[%s1940_s13 + $0x100] sm:$0xff] }
  0x45   : > { %v362_v25 = vld [vmem:[%s1940_s13 + $0x148] sm:$0xff]  ;;  %v361_v34 = vld [vmem:[%s1940_s13 + $0x140] sm:$0xff] }
  0x46   : > { %1627 = vmatprep.subr.bf16.mxu0 %v1626_v19  ;;  %v358_v26 = vld [vmem:[%s1940_s13 + $0x128] sm:$0xff]  ;;  %v1566_v30 = vpack.c.bf16 %v362_v25, %v354_v24  ;;  %v357_v35 = vld [vmem:[%s1940_s13 + $0x120] sm:$0xff]  ;;  %v1568_v41 = vpack.c.bf16 %v361_v34, %v353_v33 }
  0x47   : > { %v366_v27 = vld [vmem:[%s1940_s13 + $0x168] sm:$0xff]  ;;  %v365_v36 = vld [vmem:[%s1940_s13 + $0x160] sm:$0xff] }
  0x48   : > { %v1630_v32 = vpack.c.bf16 %v366_v27, %v358_v26  ;;  %v370_v37 = vld [vmem:[%s1940_s13 + $0x188] sm:$0xff]  ;;  %v1632_v42 = vpack.c.bf16 %v365_v36, %v357_v35  ;;  %v369_v45 = vld [vmem:[%s1940_s13 + $0x180] sm:$0xff]  ;;  %v324_v36 = vld [vmem:[%s1940_s13 + $0x18] sm:$0xff] }
  0x49   : > { %1565 = vmatpush1.bf16.xpose.msra.mxu1 %v1564_v28  ;;  %v378_v38 = vld [vmem:[%s1940_s13 + $0x1c8] sm:$0xff]  ;;  %v377_v46 = vld [vmem:[%s1940_s13 + $0x1c0] sm:$0xff] }
  0x4a   : > { %1567 = vmatprep.subr.bf16.mxu1 %v1566_v30  ;;  %v374_v39 = vld [vmem:[%s1940_s13 + $0x1a8] sm:$0xff]  ;;  %v1570_v43 = vpack.c.bf16 %v378_v38, %v370_v37  ;;  %v373_v47 = vld [vmem:[%s1940_s13 + $0x1a0] sm:$0xff]  ;;  %v1572_v53 = vpack.c.bf16 %v377_v46, %v369_v45  ;;  %v332_v37 = vld [vmem:[%s1940_s13 + $0x58] sm:$0xff] }
  0x4b   : > { %1629 = vmatpush1.bf16.xpose.msra.mxu0 %v1628_v29  ;;  %v382_v40 = vld [vmem:[%s1940_s13 + $0x1e8] sm:$0xff]  ;;  %v381_v48 = vld [vmem:[%s1940_s13 + $0x1e0] sm:$0xff]  ;;  %v328_v38 = vld [vmem:[%s1940_s13 + $0x38] sm:$0xff] }
  0x4c   : > { %1631 = vmatprep.subr.bf16.mxu0 %v1630_v32  ;;  %v1634_v44 = vpack.c.bf16 %v382_v40, %v374_v39  ;;  %v386_v49 = vld [vmem:[%s1940_s13 + $0x208] sm:$0xff]  ;;  %v1636_v54 = vpack.c.bf16 %v381_v48, %v373_v47  ;;  %v385_v57 = vld [vmem:[%s1940_s13 + $0x200] sm:$0xff]  ;;  %v336_v39 = vld [vmem:[%s1940_s13 + $0x78] sm:$0xff] }
  0x4d   : > { %v394_v50 = vld [vmem:[%s1940_s13 + $0x248] sm:$0xff]  ;;  %v393_v58 = vld [vmem:[%s1940_s13 + $0x240] sm:$0xff]  ;;  %v331_v45 = vld [vmem:[%s1940_s13 + $0x50] sm:$0xff] }
  0x4e   : > { %v390_v51 = vld [vmem:[%s1940_s13 + $0x228] sm:$0xff]  ;;  %v1574_v55 = vpack.c.bf16 %v394_v50, %v386_v49  ;;  %v389_v59 = vld [vmem:[%s1940_s13 + $0x220] sm:$0xff]  ;;  %v1576_v1 = vpack.c.bf16 %v393_v58, %v385_v57  ;;  %v327_v46 = vld [vmem:[%s1940_s13 + $0x30] sm:$0xff] }
  0x4f   : > { %v398_v52 = vld [vmem:[%s1940_s13 + $0x268] sm:$0xff]  ;;  %v397_v60 = vld [vmem:[%s1940_s13 + $0x260] sm:$0xff]  ;;  %v335_v47 = vld [vmem:[%s1940_s13 + $0x70] sm:$0xff] }
  0x50   : > { %v1638_v56 = vpack.c.bf16 %v398_v52, %v390_v51  ;;  %v402_v61 = vld [vmem:[%s1940_s13 + $0x288] sm:$0xff]  ;;  %v1640_v2 = vpack.c.bf16 %v397_v60, %v389_v59  ;;  %v401_v5 = vld [vmem:[%s1940_s13 + $0x280] sm:$0xff]  ;;  %v340_v48 = vld [vmem:[%s1940_s13 + $0x98] sm:$0xff] }
  0x51   : > { %1569 = vmatpush1.bf16.xpose.msra.mxu1 %v1568_v41  ;;  %v410_v62 = vld [vmem:[%s1940_s13 + $0x2c8] sm:$0xff]  ;;  %v409_v6 = vld [vmem:[%s1940_s13 + $0x2c0] sm:$0xff]  ;;  %v348_v49 = vld [vmem:[%s1940_s13 + $0xd8] sm:$0xff] }
  0x52   : > { %1571 = vmatprep.subr.bf16.mxu1 %v1570_v43  ;;  %v406_v63 = vld [vmem:[%s1940_s13 + $0x2a8] sm:$0xff]  ;;  %v1578_v3 = vpack.c.bf16 %v410_v62, %v402_v61  ;;  %v405_v7 = vld [vmem:[%s1940_s13 + $0x2a0] sm:$0xff]  ;;  %v1580_v13 = vpack.c.bf16 %v409_v6, %v401_v5  ;;  %v1654_v43 = vpack.c.bf16 %v336_v39, %v328_v38  ;;  %v344_v50 = vld [vmem:[%s1940_s13 + $0xb8] sm:$0xff] }
  0x53   : > { %1633 = vmatpush1.bf16.xpose.msra.mxu0 %v1632_v42  ;;  %v414_v0 = vld [vmem:[%s1940_s13 + $0x2e8] sm:$0xff]  ;;  %v413_v8 = vld [vmem:[%s1940_s13 + $0x2e0] sm:$0xff]  ;;  %v1590_v42 = vpack.c.bf16 %v332_v37, %v324_v36  ;;  %v352_v51 = vld [vmem:[%s1940_s13 + $0xf8] sm:$0xff] }
  0x54   : > { %1635 = vmatprep.subr.bf16.mxu0 %v1634_v44  ;;  %v1642_v4 = vpack.c.bf16 %v414_v0, %v406_v63  ;;  %v418_v9 = vld [vmem:[%s1940_s13 + $0x308] sm:$0xff]  ;;  %v1644_v14 = vpack.c.bf16 %v413_v8, %v405_v7  ;;  %v449_v17 = vld [vmem:[%s2445_s2] sm:$0xff]  ;;  %v323_v44 = vld [vmem:[%s1940_s13 + $0x10] sm:$0xff]  ;;  %v1658_v57 = vpack.c.bf16 %v352_v51, %v344_v50 }
  0x55   : > { %v426_v10 = vld [vmem:[%s1940_s13 + $0x348] sm:$0xff]  ;;  %v417_v18 = vld [vmem:[%s1940_s13 + $0x300] sm:$0xff]  ;;  %453 = vperm.xlu0 %1755, %v449_v17   ;;  %v308_v62 = vld [vmem:[%s2444_s1 + $0x18] sm:$0xff] }
  0x56   : > { %v422_v11 = vld [vmem:[%s1940_s13 + $0x328] sm:$0xff]  ;;  %v1582_v15 = vpack.c.bf16 %v426_v10, %v418_v9  ;;  %v425_v19 = vld [vmem:[%s1940_s13 + $0x340] sm:$0xff]  ;;  %v312_v63 = vld [vmem:[%s2444_s1 + $0x38] sm:$0xff] }
  0x57   : > { %v430_v12 = vld [vmem:[%s1940_s13 + $0x368] sm:$0xff]  ;;  %v421_v20 = vld [vmem:[%s1940_s13 + $0x320] sm:$0xff]  ;;  %v1584_v27 = vpack.c.bf16 %v425_v19, %v417_v18  ;;  %v339_v0 = vld [vmem:[%s1940_s13 + $0x90] sm:$0xff] }
  0x58   : > { %v1646_v16 = vpack.c.bf16 %v430_v12, %v422_v11  ;;  %v429_v21 = vld [vmem:[%s1940_s13 + $0x360] sm:$0xff]  ;;  %v434_v22 = vld [vmem:[%s1940_s13 + $0x388] sm:$0xff]  ;;  %v364_v5 = vld [vmem:[%s1940_s13 + $0x158] sm:$0xff] }
  0x59   : > { %1573 = vmatpush1.bf16.xpose.msra.mxu1 %v1572_v53  ;;  %v442_v23 = vld [vmem:[%s1940_s13 + $0x3c8] sm:$0xff]  ;;  %v1648_v28 = vpack.c.bf16 %v429_v21, %v421_v20  ;;  %v433_v32 = vld [vmem:[%s1940_s13 + $0x380] sm:$0xff]  ;;  %v1592_v53 = vpack.c.bf16 %v331_v45, %v323_v44  ;;  %v360_v6 = vld [vmem:[%s1940_s13 + $0x138] sm:$0xff] }
  0x5a   : > { %1575 = vmatprep.subr.bf16.mxu1 %v1574_v55  ;;  %v438_v24 = vld [vmem:[%s1940_s13 + $0x3a8] sm:$0xff]  ;;  %v1586_v29 = vpack.c.bf16 %v442_v23, %v434_v22  ;;  %v441_v33 = vld [vmem:[%s1940_s13 + $0x3c0] sm:$0xff]  ;;  %v1656_v55 = vpack.c.bf16 %v335_v47, %v327_v46  ;;  %v368_v7 = vld [vmem:[%s1940_s13 + $0x178] sm:$0xff] }
  0x5b   : > { %1637 = vmatpush1.bf16.xpose.msra.mxu0 %v1636_v54  ;;  %v446_v25 = vld [vmem:[%s1940_s13 + $0x3e8] sm:$0xff]  ;;  %v437_v34 = vld [vmem:[%s1940_s13 + $0x3a0] sm:$0xff]  ;;  %v1588_v40 = vpack.c.bf16 %v441_v33, %v433_v32  ;;  %v1662_v11 = vpack.c.bf16 %v368_v7, %v360_v6  ;;  %v355_v12 = vld [vmem:[%s1940_s13 + $0x110] sm:$0xff] }
  0x5c   : > { %1639 = vmatprep.subr.bf16.mxu0 %v1638_v56  ;;  %v450_v26 = vld [vmem:[%s2445_s2 + $0x8] sm:$0x7f]  ;;  %v1650_v30 = vpack.c.bf16 %v446_v25, %v438_v24  ;;  %v445_v35 = vld [vmem:[%s1940_s13 + $0x3e0] sm:$0xff]  ;;  %v1594_v56 = vpack.c.bf16 %v348_v49, %v340_v48  ;;  %v380_v17 = vld [vmem:[%s1940_s13 + $0x1d8] sm:$0xff] }
  0x5d   : > { %458 = vperm.xlu0 %1755, %v450_v26   ;;  %v1652_v41 = vpack.c.bf16 %v445_v35, %v437_v34  ;;  %v305_v52 = vld [vmem:[%s2444_s1] sm:$0xff]  ;;  %v314_v58 = vld [vmem:[%s2444_s1 + $0x48] sm:$0x7f]  ;;  %v376_v18 = vld [vmem:[%s1940_s13 + $0x1b8] sm:$0xff] }
  0x5e   : > { %v309_v54 = vld [vmem:[%s2444_s1 + $0x20] sm:$0xff]  ;;  %v318_v59 = vld [vmem:[%s2444_s1 + $0x68] sm:$0x7f]  ;;  %v384_v19 = vld [vmem:[%s1940_s13 + $0x1f8] sm:$0xff] }
  0x5f   : > { %v313_v60 = vld [vmem:[%s2444_s1 + $0x40] sm:$0x7f]  ;;  %v1666_v23 = vpack.c.bf16 %v384_v19, %v376_v18  ;;  %v371_v24 = vld [vmem:[%s1940_s13 + $0x190] sm:$0xff] }
  0x60   : > { %v317_v61 = vld [vmem:[%s2444_s1 + $0x60] sm:$0x7f]  ;;  %v379_v25 = vld [vmem:[%s1940_s13 + $0x1d0] sm:$0xff] }
  0x61   : > { %1577 = vmatpush1.bf16.xpose.msra.mxu1 %v1576_v1  ;;  %973 = vperm.xlu0 %1755, %v960_v31   ;;  %v347_v1 = vld [vmem:[%s1940_s13 + $0xd0] sm:$0xff]  ;;  %v400_v31 = vld [vmem:[%s1940_s13 + $0x278] sm:$0xff]  ;;  %v1604_v32 = vpack.c.bf16 %v379_v25, %v371_v24 }
  0x62   : > { %1579 = vmatprep.subr.bf16.mxu1 %v1578_v3  ;;  %v351_v3 = vld [vmem:[%s1940_s13 + $0xf0] sm:$0xff]  ;;  %v1596_v8 = vpack.c.bf16 %v347_v1, %v339_v0  ;;  %v436_v0 = vld [vmem:[%s1940_s13 + $0x398] sm:$0xff] }
  0x63   : > { %1641 = vmatpush1.bf16.xpose.msra.mxu0 %v1640_v2  ;;  %v343_v2 = vld [vmem:[%s1940_s13 + $0xb0] sm:$0xff]  ;;  %v444_v1 = vld [vmem:[%s1940_s13 + $0x3d8] sm:$0xff] }
  0x64   : > { %1643 = vmatprep.subr.bf16.mxu0 %v1642_v4  ;;  %v356_v4 = vld [vmem:[%s1940_s13 + $0x118] sm:$0xff]  ;;  %v1660_v9 = vpack.c.bf16 %v351_v3, %v343_v2  ;;  %v375_v26 = vld [vmem:[%s1940_s13 + $0x1b0] sm:$0xff]  ;;  %v1618_v6 = vpack.c.bf16 %v444_v1, %v436_v0 }
  0x65   : > { %v1598_v10 = vpack.c.bf16 %v364_v5, %v356_v4  ;;  %v387_v36 = vld [vmem:[%s1940_s13 + $0x210] sm:$0xff]  ;;  %v440_v2 = vld [vmem:[%s1940_s13 + $0x3b8] sm:$0xff] }
  0x66   : > { %v395_v37 = vld [vmem:[%s1940_s13 + $0x250] sm:$0xff]  ;;  %v448_v3 = vld [vmem:[%s1940_s13 + $0x3f8] sm:$0xff] }
  0x67   : > { %v391_v38 = vld [vmem:[%s1940_s13 + $0x230] sm:$0xff]  ;;  %v1608_v44 = vpack.c.bf16 %v395_v37, %v387_v36  ;;  %v1682_v7 = vpack.c.bf16 %v448_v3, %v440_v2 }
  0x68   : > { %v399_v39 = vld [vmem:[%s1940_s13 + $0x270] sm:$0xff] }
  0x69   : > { %1581 = vmatpush1.bf16.xpose.msra.mxu1 %v1580_v13  ;;  %v363_v13 = vld [vmem:[%s1940_s13 + $0x150] sm:$0xff]  ;;  %v1672_v45 = vpack.c.bf16 %v399_v39, %v391_v38 }
  0x6a   : > { %1583 = vmatprep.subr.bf16.mxu1 %v1582_v15  ;;  %v367_v15 = vld [vmem:[%s1940_s13 + $0x170] sm:$0xff]  ;;  %v1600_v20 = vpack.c.bf16 %v363_v13, %v355_v12 }
  0x6b   : > { %1645 = vmatpush1.bf16.xpose.msra.mxu0 %v1644_v14  ;;  %v359_v14 = vld [vmem:[%s1940_s13 + $0x130] sm:$0xff] }
  0x6c   : > { %1647 = vmatprep.subr.bf16.mxu0 %v1646_v16  ;;  %v372_v16 = vld [vmem:[%s1940_s13 + $0x198] sm:$0xff]  ;;  %v1664_v21 = vpack.c.bf16 %v367_v15, %v359_v14  ;;  %v403_v48 = vld [vmem:[%s1940_s13 + $0x290] sm:$0xff] }
  0x6d   : > { %v1602_v22 = vpack.c.bf16 %v380_v17, %v372_v16  ;;  %v411_v49 = vld [vmem:[%s1940_s13 + $0x2d0] sm:$0xff]  ;;  %v316_v16 = vld [vmem:[%s2444_s1 + $0x58] sm:$0x7f] }
  0x6e   : > { %v407_v50 = vld [vmem:[%s1940_s13 + $0x2b0] sm:$0xff]  ;;  %v320_v17 = vld [vmem:[%s2444_s1 + $0x78] sm:$0x7f] }
  0x6f   : > { %v415_v51 = vld [vmem:[%s1940_s13 + $0x2f0] sm:$0xff] }
  0x70   : > { %v307_v14 = vld [vmem:[%s2444_s1 + $0x10] sm:$0xff] }
  0x71   : > { %1585 = vmatpush1.bf16.xpose.msra.mxu1 %v1584_v27  ;;  %v383_v27 = vld [vmem:[%s1940_s13 + $0x1f0] sm:$0xff] }
  0x72   : > { %1587 = vmatprep.subr.bf16.mxu1 %v1586_v29  ;;  %v396_v29 = vld [vmem:[%s1940_s13 + $0x258] sm:$0xff]  ;;  %v1668_v33 = vpack.c.bf16 %v383_v27, %v375_v26  ;;  %v311_v15 = vld [vmem:[%s2444_s1 + $0x30] sm:$0xff] }
  0x73   : > { %1649 = vmatpush1.bf16.xpose.msra.mxu0 %v1648_v28  ;;  %v388_v28 = vld [vmem:[%s1940_s13 + $0x218] sm:$0xff]  ;;  %v315_v18 = vld [vmem:[%s2444_s1 + $0x50] sm:$0x7f] }
  0x74   : > { %1651 = vmatprep.subr.bf16.mxu0 %v1650_v30  ;;  %v392_v30 = vld [vmem:[%s1940_s13 + $0x238] sm:$0xff]  ;;  %v1606_v34 = vpack.c.bf16 %v396_v29, %v388_v28  ;;  %v319_v19 = vld [vmem:[%s2444_s1 + $0x70] sm:$0x7f] }
  0x75   : > { %v1670_v35 = vpack.c.bf16 %v400_v31, %v392_v30 }
  0x79   : > { %1589 = vmatpush1.bf16.xpose.msra.mxu1 %v1588_v40  ;;  %v404_v40 = vld [vmem:[%s1940_s13 + $0x298] sm:$0xff] }
  0x7a   : > { %1591 = vmatprep.subr.bf16.mxu1 %v1590_v42  ;;  %v408_v42 = vld [vmem:[%s1940_s13 + $0x2b8] sm:$0xff] }
  0x7b   : > { %1653 = vmatpush1.bf16.xpose.msra.mxu0 %v1652_v41  ;;  %v412_v41 = vld [vmem:[%s1940_s13 + $0x2d8] sm:$0xff] }
  0x7c   : > { %1655 = vmatprep.subr.bf16.mxu0 %v1654_v43  ;;  %v416_v43 = vld [vmem:[%s1940_s13 + $0x2f8] sm:$0xff]  ;;  %v1610_v46 = vpack.c.bf16 %v412_v41, %v404_v40 }
  0x7d   : > { %v1674_v47 = vpack.c.bf16 %v416_v43, %v408_v42  ;;  %v2464_v43 = vmov 0 }
  0x80   : > { %526 = vmatmul.mubr.f32.vlgmr.msra.gmra.mrb[0].mxu1 %v305_v52  ;;  %v420_v52 = vld [vmem:[%s1940_s13 + $0x318] sm:$0xff] }
  0x81   : > { %1593 = vmatpush1.bf16.xpose.msra.mxu1 %v1592_v53  ;;  %530 = vmatprep.mubr.f32.mxu1 %v314_v58  ;;  %v428_v53 = vld [vmem:[%s1940_s13 + $0x358] sm:$0xff] }
  0x82   : > { %676 = vmatmul.mubr.f32.vlgmr.msra.gmra.mrb[0].mxu0 %v309_v54  ;;  %1595 = vmatprep.subr.bf16.mxu1 %v1594_v56  ;;  %v424_v54 = vld [vmem:[%s1940_s13 + $0x338] sm:$0xff]  ;;  %v1612_v56 = vpack.c.bf16 %v411_v49, %v403_v48  ;;  %v1614_v58 = vpack.c.bf16 %v428_v53, %v420_v52 }
  0x83   : > { %1657 = vmatpush1.bf16.xpose.msra.mxu0 %v1656_v55  ;;  %680 = vmatprep.mubr.f32.mxu0 %v318_v59  ;;  %v432_v55 = vld [vmem:[%s1940_s13 + $0x378] sm:$0xff] }
  0x84   : > { %1659 = vmatprep.subr.bf16.mxu0 %v1658_v57  ;;  %531 = vmatmul.mubr.f32.gmra.mrb[2].mxu1 %v313_v60  ;;  %v1676_v57 = vpack.c.bf16 %v415_v51, %v407_v50  ;;  %v1678_v59 = vpack.c.bf16 %v432_v55, %v424_v54  ;;  %v419_v60 = vld [vmem:[%s1940_s13 + $0x310] sm:$0xff] }
  0x85   : > { %600 = vmatprep.mubr.f32.mxu1 %v308_v62  ;;  %v423_v62 = vld [vmem:[%s1940_s13 + $0x330] sm:$0xff] }
  0x86   : > { %681 = vmatmul.mubr.f32.gmra.mrb[2].mxu0 %v317_v61  ;;  %v427_v61 = vld [vmem:[%s1940_s13 + $0x350] sm:$0xff] }
  0x87   : > { %750 = vmatprep.mubr.f32.mxu0 %v312_v63  ;;  %v431_v63 = vld [vmem:[%s1940_s13 + $0x370] sm:$0xff]  ;;  %v1616_v4 = vpack.c.bf16 %v427_v61, %v419_v60  ;;  %v916_v60 = vstv %s2151_s19  ;;  %s1532_s19 = sld [smem:[#allocation4 + $0x3]] }
  0x88   : > { %v1680_v5 = vpack.c.bf16 %v431_v63, %v423_v62 }
  0x89   : > { %1597 = vmatpush1.bf16.xpose.msra.mxu1 %v1596_v8  ;;  %v435_v8 = vld [vmem:[%s1940_s13 + $0x390] sm:$0xff] }
  0x8a   : > { %1599 = vmatprep.subr.bf16.mxu1 %v1598_v10  ;;  %v439_v10 = vld [vmem:[%s1940_s13 + $0x3b0] sm:$0xff] }
  0x8b   : > { %1661 = vmatpush1.bf16.xpose.msra.mxu0 %v1660_v9  ;;  %v443_v9 = vld [vmem:[%s1940_s13 + $0x3d0] sm:$0xff] }
  0x8c   : > { %1663 = vmatprep.subr.bf16.mxu0 %v1662_v11  ;;  %v447_v11 = vld [vmem:[%s1940_s13 + $0x3f0] sm:$0xff]  ;;  %v1620_v12 = vpack.c.bf16 %v443_v9, %v435_v8  ;;  %v926_v8 = vstv %s2176_s21  ;;  %s2357_s21 = sld [smem:[#allocation4 + $0x5]] }
  0x8d   : > { %v1684_v13 = vpack.c.bf16 %v447_v11, %v439_v10 }
  0x91   : > { %1601 = vmatpush1.bf16.xpose.msra.mxu1 %v1600_v20  ;;  %v1822_v20 = vmov 0.0|0.0  }
  0x92   : > { %1603 = vmatprep.subr.bf16.mxu1 %v1602_v22  ;;  %v958_v22 = vld [vmem:[%s2447_s4] sm:$0xff] }
  0x93   : > { %1665 = vmatpush1.bf16.xpose.msra.mxu0 %v1664_v21  ;;  %v1824_v21 = vmov 0.0   ;;  %963 = vperm.xlu1 %1756, %v958_v22  }
  0x94   : > { %1667 = vmatprep.subr.bf16.mxu0 %v1666_v23  ;;  %v959_v23 = vld [vmem:[%s2447_s4 + $0x8] sm:$0xff] }
  0x97   : > { %968 = vperm.xlu1 %1756, %v959_v23  }
  0x99   : > { %1605 = vmatpush1.bf16.xpose.msra.mxu1 %v1604_v32 }
  0x9a   : > { %1607 = vmatprep.subr.bf16.mxu1 %v1606_v34 }
  0x9b   : > { %1669 = vmatpush1.bf16.xpose.msra.mxu0 %v1668_v33 }
  0x9c   : > { %1671 = vmatprep.subr.bf16.mxu0 %v1670_v35 }
  0xa1   : > { %1609 = vmatpush1.bf16.xpose.msra.mxu1 %v1608_v44  ;;  %v2466_v44 = vmov 0 }
  0xa2   : > { %1611 = vmatprep.subr.bf16.mxu1 %v1610_v46 }
  0xa3   : > { %1673 = vmatpush1.bf16.xpose.msra.mxu0 %v1672_v45 }
  0xa4   : > { %1675 = vmatprep.subr.bf16.mxu0 %v1674_v47 }
  0xa9   : > { %1613 = vmatpush1.bf16.xpose.msra.mxu1 %v1612_v56 }
  0xaa   : > { %1615 = vmatprep.subr.bf16.mxu1 %v1614_v58 }
  0xab   : > { %1677 = vmatpush1.bf16.xpose.msra.mxu0 %v1676_v57 }
  0xac   : > { %1679 = vmatprep.subr.bf16.mxu0 %v1678_v59 }
  0xb1   : > { %1617 = vmatpush1.bf16.xpose.msra.mxu1 %v1616_v4  ;;  %v920_v4 = vstv %s2169_s20  ;;  %s2337_s20 = sld [smem:[#allocation4 + $0x4]] }
  0xb2   : > { %1619 = vmatprep.subr.bf16.mxu1 %v1618_v6 }
  0xb3   : > { %1681 = vmatpush1.bf16.xpose.msra.mxu0 %v1680_v5 }
  0xb4   : > { %1683 = vmatprep.subr.bf16.mxu0 %v1682_v7 }
  0xb9   : > { %1621 = vmatpush1.bf16.xpose.msra.mxu1 %v1620_v12  ;;  %v932_v12 = vstv %s2179_s22  ;;  %s295_s22 = sand.u32 1, %s1809_s24  }
  0xba   : > { %1690 = vmatprep.subr.bf16.mxu1 %v1822_v20  ;;  %s2381_s24 = smul.u32 24, %s295_s22 }
  0xbb   : > { %1685 = vmatpush1.bf16.xpose.msra.mxu0 %v1684_v13 }
  0xbc   : > { %1686 = vmatprep.subr.bf16.mxu0 %v1822_v20 }
  0xc0   : > { %601 = vmatmul.mubr.f32.vlgmr.msra.gmra.mrb[0].mxu1 %v307_v14 }
  0xc1   : > { %605 = vmatprep.mubr.f32.mxu1 %v316_v16  ;;  %v938_v16 = vstv %s2194_s23  ;;  %s2399_s23 = scalar_lea.vmem [#allocation6], %s2381_s24 }
  0xc2   : > { %751 = vmatmul.mubr.f32.vlgmr.msra.gmra.mrb[0].mxu0 %v311_v15 }
  0xc3   : > { %755 = vmatprep.mubr.f32.mxu0 %v320_v17 }
  0xc4   : > { %606 = vmatmul.mubr.f32.gmra.mrb[2].mxu1 %v315_v18 }
  0xc5   : > { %1555 = vmatprep.mubr.msk.f32.mxu1 %vm2453_vm0, %v1824_v21 }
  0xc6   : > { %756 = vmatmul.mubr.f32.gmra.mrb[2].mxu0 %v319_v19 }
  0xc7   : > { %1549 = vmatprep.mubr.msk.f32.mxu0 %vm2453_vm0, %v1824_v21 }
  0xd4   : > { %v454_v24 = vpop.permute.xlu0 %453 }
  0xdc   : > { %v459_v31 = vpop.permute.xlu0 %458 }
 0x193   : > { %v602_v25 = vpop.f32.mrb[0].mxu1 }
 0x194   : > { %v1692_v26 = vadd.f32 %v602_v25, %v454_v24  ;;  %v604_v28 = vpop.f32.mrb[1].mxu1 }
 0x195   : > { %v752_v27 = vpop.f32.mrb[0].mxu0 }
 0x196   : > { %v754_v29 = vpop.f32.mrb[1].mxu0  ;;  %v1693_v30 = vadd.f32 %v1692_v26, %v752_v27 }
 0x197   : > { %v607_v32 = vpop.f32.mrb[2].mxu1 }
 0x198   : > { %v761_v33 = vmax.f32 %v1693_v30, -3.401  ;;  %v1694_v34 = vadd.f32 %v607_v32, %v459_v31  ;;  %v609_v36 = vpop.f32.mrb[3].mxu1 }
 0x199   : > { %v757_v35 = vpop.f32.mrb[2].mxu0 }
 0x19a   : > { %v759_v37 = vpop.f32.mrb[3].mxu0  ;;  %v2131_v38 = vmin.f32 %v761_v33, 33.232  ;;  %v1695_v39 = vadd.f32 %v1694_v34, %v757_v35 }
 0x19c   : > { %v762_v40 = vmax.f32 %v1695_v39, -3.401  ;;  %vm765_vm1 = vcmp.ge.f32.partialorder %v2131_v38, -3.401  ;;  %vm767_vm2 = vcmp.lt.f32.partialorder %v2131_v38, 3.9256 }
 0x19d   : > { %vm773_vm3 = vcmp.ge.f32.partialorder %v2131_v38, 3.9256  ;;  %vm775_vm4 = vcmp.lt.f32.partialorder %v2131_v38, 11.2522  ;;  %vm781_vm5 = vcmp.ge.f32.partialorder %v2131_v38, 11.2522  ;;  %vm2140_vm6 = vmand %vm765_vm1, %vm767_vm2 }
 0x19e   : > { %v2138_v41 = vmin.f32 %v762_v40, 33.232  ;;  %vm783_vm7 = vcmp.lt.f32.partialorder %v2131_v38, 18.5788  ;;  %vm2145_vm8 = vmand %vm773_vm3, %vm775_vm4  ;;  %vm789_vm9 = vcmp.ge.f32.partialorder %v2131_v38, 18.5788 }
 0x19f   : > { %v2465_v43 = vsel %vm2145_vm8, 4294967295, %v2464_v43  ;;  %vm791_vm10 = vcmp.lt.f32.partialorder %v2131_v38, 25.9054  ;;  %vm2156_vm14 = vmand %vm781_vm5, %vm783_vm7  ;;  %vm797_vm7 = vcmp.ge.f32.partialorder %v2131_v38, 25.9054  ;;  %v771_v47 = vsel %vm2140_vm6, 1.0, %v1824_v21 }
 0x1a0   : > { %vm766_vm11 = vcmp.ge.f32.partialorder %v2138_v41, -3.401  ;;  %vm768_vm12 = vcmp.lt.f32.partialorder %v2138_v41, 3.9256  ;;  %vm774_vm13 = vcmp.ge.f32.partialorder %v2138_v41, 3.9256  ;;  %vm2163_vm3 = vmand %vm789_vm9, %vm791_vm10  ;;  %vm2472_vm10 = vnez %v2465_v43 }
 0x1a1   : > { %v2467_v44 = vsel %vm2156_vm14, 4294967295, %v2466_v44  ;;  %vm776_vm15 = vcmp.lt.f32.partialorder %v2138_v41, 11.2522  ;;  %vm782_vm1 = vcmp.ge.f32.partialorder %v2138_v41, 11.2522  ;;  %vm770_vm4 = vmand %vm766_vm11, %vm768_vm12  ;;  %v779_v48 = vsel %vm2472_vm10, 1.0, %v1824_v21 }
 0x1a2   : > { %vm784_vm2 = vcmp.lt.f32.partialorder %v2138_v41, 18.5788  ;;  %vm790_vm0 = vcmp.ge.f32.partialorder %v2138_v41, 18.5788  ;;  %vm792_vm8 = vcmp.lt.f32.partialorder %v2138_v41, 25.9054  ;;  %vm2171_vm5 = vmand %vm774_vm13, %vm776_vm15  ;;  %vm2475_vm12 = vnez %v2467_v44 }
 0x1a3   : > { %vm786_vm14 = vmand %vm782_vm1, %vm784_vm2  ;;  %vm799_vm9 = vcmp.le.f32.partialorder %v2131_v38, 33.232  ;;  %v2192_v50 = vadd.f32 -3.9256, %v2131_v38  ;;  %v772_v51 = vsel %vm770_vm4, 1.0, %v1824_v21  ;;  %v787_v52 = vsel %vm2475_vm12, 1.0, %v1824_v21 }
 0x1a4   : > { %vm2187_vm11 = vmand %vm790_vm0, %vm792_vm8  ;;  %v2201_v53 = vadd.f32 3.401, %v2131_v38  ;;  %v2204_v54 = vadd.f32 3.401, %v2138_v41  ;;  %v780_v55 = vsel %vm2171_vm5, 1.0, %v1824_v21  ;;  %v788_v56 = vsel %vm786_vm14, 1.0, %v1824_v21 }
 0x1a5   : > { %vm801_vm6 = vmand %vm797_vm7, %vm799_vm9  ;;  %v795_v57 = vsel %vm2163_vm3, 1.0, %v1824_v21  ;;  %vm798_vm0 = vcmp.ge.f32.partialorder %v2138_v41, 25.9054  ;;  %vm800_vm8 = vcmp.le.f32.partialorder %v2138_v41, 33.232  ;;  %v796_v61 = vsel %vm2187_vm11, 1.0, %v1824_v21 }
 0x1a6   : > { %v2216_v58 = vadd.f32 -3.9256, %v2138_v41  ;;  %v2219_v59 = vadd.f32 -11.2522, %v2131_v38  ;;  %v803_v62 = vsel %vm801_vm6, 1.0, %v1824_v21  ;;  %vm802_vm13 = vmand %vm798_vm0, %vm800_vm8  ;;  %vm986_vm14 = vcmask 1046528  }
 0x1a7   : > { %v807_v63 = vmul.f32 -0.13648896, %v2192_v50  ;;  %v2228_v0 = vadd.f32 -11.2522, %v2138_v41  ;;  %v813_v1 = vmul.f32 0.13648896, %v2201_v53 }
 0x1a8   : > { %v2232_v2 = vmul.f32 0.13648896, %v2204_v54  ;;  %v825_v3 = vmul.f32 0.13648896, %v2192_v50  ;;  %v819_v5 = vmul.f32 -0.13648896, %v2219_v59 }
 0x1a9   : > { %v2238_v6 = vadd.f32 -18.5788, %v2131_v38  ;;  %v2241_v7 = vadd.f32 -18.5788, %v2138_v41  ;;  %v820_v9 = vmul.f32 -0.13648896, %v2228_v0  ;;  %v809_v18 = vmul.f32 %v807_v63, %v771_v47 }
 0x1aa   : > { %v826_v10 = vmul.f32 0.13648896, %v2216_v58  ;;  %v837_v11 = vmul.f32 0.13648896, %v2219_v59  ;;  %v1498_v15 = vadd.f32 -25.9054, %v2131_v38  ;;  %v815_v19 = vmul.f32 %v813_v1, %v771_v47 }
 0x1ab   : > { %v831_v13 = vmul.f32 -0.13648896, %v2238_v6  ;;  %v832_v14 = vmul.f32 -0.13648896, %v2241_v7  ;;  %v808_v17 = vmul.f32 -0.13648896, %v2216_v58  ;;  %v816_v22 = vmul.f32 %v2232_v2, %v772_v51 }
 0x1ac   : > { %v1499_v20 = vadd.f32 -25.9054, %v2138_v41  ;;  %v821_v23 = vmul.f32 %v819_v5, %v779_v48  ;;  %v827_v24 = vmul.f32 %v825_v3, %v779_v48  ;;  %v843_v25 = vmul.f32 -0.13648896, %v1498_v15 }
 0x1ad   : > { %v822_v26 = vmul.f32 %v820_v9, %v780_v55  ;;  %v828_v27 = vmul.f32 %v826_v10, %v780_v55  ;;  %v838_v28 = vmul.f32 0.13648896, %v2228_v0  ;;  %v833_v30 = vmul.f32 %v831_v13, %v787_v52 }
 0x1ae   : > { %v844_v29 = vmul.f32 -0.13648896, %v1499_v20  ;;  %v834_v31 = vmul.f32 %v832_v14, %v788_v56  ;;  %v839_v32 = vmul.f32 %v837_v11, %v787_v52  ;;  %v1500_v33 = vadd.f32 -33.232, %v2131_v38 }
 0x1af   : > { %v845_v34 = vmul.f32 %v843_v25, %v795_v57  ;;  %v849_v35 = vmul.f32 0.13648896, %v2238_v6  ;;  %v850_v36 = vmul.f32 0.13648896, %v2241_v7  ;;  %v1501_v37 = vadd.f32 -33.232, %v2138_v41 }
 0x1b0   : > { %v804_v39 = vsel %vm802_vm13, 1.0, %v1824_v21  ;;  %v810_v40 = vmul.f32 %v808_v17, %v772_v51  ;;  %v823_v42 = vadd.f32 %v821_v23, %v815_v19  ;;  %v2265_v43 = vmul.f32 -0.13648896, %v1500_v33 }
 0x1b1   : > { %v840_v44 = vmul.f32 %v838_v28, %v788_v56  ;;  %v846_v45 = vmul.f32 %v844_v29, %v796_v61  ;;  %v2267_v46 = vmul.f32 -0.13648896, %v1501_v37  ;;  %v2269_v47 = vmul.f32 0.13648896, %v1498_v15 }
 0x1b2   : > { %v824_v38 = vadd.f32 %v822_v26, %v816_v22  ;;  %v835_v48 = vadd.f32 %v833_v30, %v827_v24  ;;  %v836_v49 = vadd.f32 %v834_v31, %v828_v27  ;;  %v865_v52 = vmul.f32 %v809_v18, %v807_v63 }
 0x1b3   : > { %v847_v55 = vadd.f32 %v845_v34, %v839_v32  ;;  %v851_v3 = vmul.f32 %v849_v35, %v795_v57  ;;  %v852_v5 = vmul.f32 %v850_v36, %v796_v61  ;;  %v2271_v41 = vmul.f32 0.13648896, %v1499_v20 }
 0x1b4   : > { %v857_v51 = vmul.f32 %v2265_v43, %v803_v62  ;;  %v858_v9 = vmul.f32 %v2267_v46, %v804_v39  ;;  %v869_v56 = vmul.f32 -0.06824448, %v2219_v59  ;;  %v870_v10 = vmul.f32 -0.06824448, %v2228_v0 }
 0x1b5   : > { %v848_v11 = vadd.f32 %v846_v45, %v840_v44  ;;  %v2278_v13 = vmul.f32 %v2269_v47, %v803_v62  ;;  %v866_v14 = vmul.f32 %v810_v40, %v808_v17  ;;  %v867_v19 = vmul.f32 %v813_v1, %v809_v18 }
 0x1b6   : > { %v871_v63 = vmul.f32 %v869_v56, %v823_v42  ;;  %v872_v22 = vmul.f32 %v870_v10, %v824_v38  ;;  %v875_v57 = vmul.f32 0.06824448, %v2201_v53  ;;  %v876_v61 = vmul.f32 0.06824448, %v2204_v54 }
 0x1b7   : > { %v864_v23 = vmul.f32 %v2271_v41, %v804_v39  ;;  %v868_v24 = vmul.f32 %v2232_v2, %v810_v40  ;;  %v879_v25 = vmul.f32 -0.06824448, %v2238_v6  ;;  %v880_v26 = vmul.f32 -0.06824448, %v2241_v7 }
 0x1b8   : > { %v859_v27 = vadd.f32 %v857_v51, %v851_v3  ;;  %v860_v28 = vadd.f32 %v858_v9, %v852_v5  ;;  %v877_v62 = vmul.f32 %v875_v57, %v823_v42  ;;  %v878_v29 = vmul.f32 %v876_v61, %v824_v38 }
 0x1b9   : > { %v881_v17 = vmul.f32 %v879_v25, %v835_v48  ;;  %v882_v1 = vmul.f32 %v880_v26, %v836_v49  ;;  %v885_v18 = vmul.f32 0.06824448, %v2192_v50  ;;  %v889_v30 = vmul.f32 -0.06824448, %v1498_v15 }
 0x1ba   : > { %v873_v53 = vadd.f32 %v871_v63, %v867_v19  ;;  %v874_v31 = vadd.f32 %v872_v22, %v868_v24  ;;  %v886_v54 = vmul.f32 0.06824448, %v2216_v58  ;;  %v890_v32 = vmul.f32 -0.06824448, %v1499_v20 }
 0x1bb   : > { %v887_v34 = vmul.f32 %v885_v18, %v835_v48  ;;  %v891_v2 = vmul.f32 %v889_v30, %v847_v55  ;;  %v895_v35 = vmul.f32 0.06824448, %v2219_v59  ;;  %v899_v36 = vmul.f32 -0.06824448, %v1500_v33 }
 0x1bc   : > { %v888_v39 = vmul.f32 %v886_v54, %v836_v49  ;;  %v892_v40 = vmul.f32 %v890_v32, %v848_v11  ;;  %v896_v42 = vmul.f32 0.06824448, %v2228_v0  ;;  %v900_v44 = vmul.f32 -0.06824448, %v1501_v37 }
 0x1bd   : > { %v883_v50 = vadd.f32 %v881_v17, %v877_v62  ;;  %v897_v15 = vmul.f32 %v895_v35, %v847_v55  ;;  %v901_v58 = vmul.f32 %v899_v36, %v859_v27  ;;  %v905_v20 = vmul.f32 0.06824448, %v2238_v6 }
 0x1be   : > { %v884_v45 = vadd.f32 %v882_v1, %v878_v29  ;;  %v898_v59 = vmul.f32 %v896_v42, %v848_v11  ;;  %v902_v33 = vmul.f32 %v900_v44, %v860_v28  ;;  %v906_v38 = vmul.f32 0.06824448, %v2241_v7 }
 0x1bf   : > { %v893_v48 = vadd.f32 %v891_v2, %v887_v34  ;;  %v907_v49 = vmul.f32 %v905_v20, %v859_v27  ;;  %v917_v0 = vmul.f32 %v916_v60, %v865_v52  ;;  %v921_v37 = vmul.f32 %v920_v4, %v873_v53 }
 0x1c0   : > { %v894_v55 = vadd.f32 %v892_v40, %v888_v39  ;;  %v908_v3 = vmul.f32 %v906_v38, %v860_v28  ;;  %v918_v6 = vmul.f32 %v916_v60, %v866_v14  ;;  %v922_v5 = vmul.f32 %v920_v4, %v874_v31  ;;  %v974_v40 = vpop.permute.xlu0 %973 }
 0x1c1   : > { %v903_v51 = vadd.f32 %v901_v58, %v897_v15  ;;  %v909_v7 = vmul.f32 %v2278_v13, %v2265_v43  ;;  %v923_v9 = vadd.f32 %v921_v37, %v917_v0  ;;  %v927_v52 = vmul.f32 %v926_v8, %v883_v50 }
 0x1c2   : > { %v904_v56 = vadd.f32 %v902_v33, %v898_v59  ;;  %v910_v10 = vmul.f32 %v864_v23, %v2267_v46  ;;  %v924_v11 = vadd.f32 %v922_v5, %v918_v6  ;;  %v928_v19 = vmul.f32 %v926_v8, %v884_v45 }
 0x1c3   : > { %v911_v60 = vadd.f32 %v909_v7, %v907_v49  ;;  %v929_v14 = vadd.f32 %v927_v52, %v923_v9  ;;  %v933_v4 = vmul.f32 %v932_v12, %v893_v48  ;;  %v934_v57 = vmul.f32 %v932_v12, %v894_v55 }
 0x1c4   : > { %v912_v63 = vadd.f32 %v910_v10, %v908_v3  ;;  %v930_v22 = vadd.f32 %v928_v19, %v924_v11  ;;  %v944_v43 = vstv %s2290_s26  ;;  %v939_v24 = vmul.f32 %v938_v16, %v903_v51  ;;  %s1536_s26 = sshll.u32 (%p2477_p7), %s1879_s27, 3 }
 0x1c5   : > { %v935_v61 = vadd.f32 %v933_v4, %v929_v14  ;;  %v913_v25 = vmul.f32 %v2278_v13, %v2269_v47  ;;  %v914_v46 = vmul.f32 %v864_v23, %v2271_v41  ;;  %v940_v8 = vmul.f32 %v938_v16, %v904_v56  ;;  %v955_v16 = vld [vmem:[%s2446_s3] sm:$0xff]  ;;  %v957_v41 = vld [vmem:[%s2446_s3 + $0x10] sm:$0x7]  ;;  %v956_v13 = vld [vmem:[%s2446_s3 + $0x8] sm:$0xff]  ;;  %v964_v23 = vpop.permute.xlu1 %963  ;;  %s1365_s10 = scalar_lea.vmem (%p2477_p7), %s2450_s7, %s1536_s26 }
 0x1c6   : > { %v936_v26 = vadd.f32 %v934_v57, %v930_v22  ;;  %v945_v28 = vmul.f32 %v944_v43, %v911_v60  ;;  %v950_v62 = vstv %s2298_s29  ;;  %v946_v17 = vmul.f32 %v944_v43, %v912_v63 }
 0x1c7   : > { %v941_v27 = vadd.f32 %v939_v24, %v935_v61  ;;  %v951_v18 = vmul.f32 %v950_v62, %v913_v25  ;;  %v952_v30 = vmul.f32 %v950_v62, %v914_v46  ;;  %vm1825_vm15 = vmmov 1  }
 0x1c8   : > { %v942_v29 = vadd.f32 %v940_v8, %v936_v26  ;;  %vm1688_vm1 = vmpackc.low %vm986_vm14, %vm1825_vm15  ;;  %vm976_vm2 = vcmask 121856   ;;  %vm2476_vm3 = vmmov 0   ;;  %v2339_v15 = vstv %s1301_s15 }
 0x1c9   : > { %v947_v1 = vadd.f32 %v945_v28, %v941_v27  ;;  %v2341_v58 = vstv %s1530_s16  ;;  %v2343_v20 = vstv %s1535_s17  ;;  %v2345_v45 = vstv %s1531_s18 }
 0x1ca   : > { %v948_v12 = vadd.f32 %v946_v17, %v942_v29  ;;  %v2348_v49 = vstv %s1532_s19  ;;  %v2355_v10 = vstv %s2337_s20 }
 0x1cb   : > { %v953_v53 = vadd.f32 %v951_v18, %v947_v1 }
 0x1cc   : > { %v954_v31 = vadd.f32 %v952_v30, %v948_v12 }
 0x1ce   : > { %v1687_v47 = vpack.c.bf16 %v954_v31, %v953_v53 }
 0x1d0   : > { %1689 = vmatpush3.bf16.msk.msra.mxu0 %vm1688_vm1, %v1687_v47  ;;  %1691 = vmatpush3.bf16.msk.msra.mxu1 %vm1688_vm1, %v1687_v47 }
 0x1d3   : > { %1550 = vmatmul.mubr.msk.f32.vlgmr.msra.gmra.mrb[4].mxu0 %vm976_vm2, %v955_v16  ;;  %1556 = vmatmul.mubr.msk.f32.vlgmr.msra.gmra.mrb[4].mxu1 %vm976_vm2, %v957_v41 }
 0x1d4   : > { %1552 = vmatprep.mubr.msk.f32.mxu0 %vm2476_vm3, %v1824_v21 }
 0x1d7   : > { %1553 = vmatmul.mubr.msk.f32.gmra.mrb[6].mxu0 %vm976_vm2, %v956_v13 }
 0x2a6   : > { %v1056_v54 = vpop.f32.mrb[4].mxu0  ;;  %v1066_v32 = vpop.f32.mrb[4].mxu1 }
 0x2a7   : > { %v1057_v34 = vadd.f32 %v1056_v54, %v964_v23  ;;  %v1551_v2 = vpop.f32.mrb[5].mxu0  ;;  %v1557_v35 = vpop.f32.mrb[5].mxu1  ;;  %v1067_v50 = vadd.f32 %v1066_v32, %v974_v40 }
 0x2a9   : > { %v1070_v36 = vmax.f32 %v1057_v34, -3.401  ;;  %v1072_v59 = vmax.f32 %v1067_v50, -3.401 }
 0x2aa   : > { %v2335_v39 = vpop.f32.mrb[6].mxu0 }
 0x2ab   : > { %v1073_v42 = vmin.f32 %v1070_v36, 33.232  ;;  %v1554_v44 = vpop.f32.mrb[7].mxu0  ;;  %v2359_v27 = vmin.f32 %v1072_v59, 33.232 }
 0x2ad   : > { %vm1076_vm4 = vcmp.ge.f32.partialorder %v1073_v42, -3.401  ;;  %vm1079_vm5 = vcmp.lt.f32.partialorder %v1073_v42, 3.9256  ;;  %vm1088_vm7 = vcmp.ge.f32.partialorder %v1073_v42, 3.9256 }
 0x2ae   : > { %vm1082_vm9 = vmand %vm1076_vm4, %vm1079_vm5  ;;  %vm1091_vm10 = vcmp.lt.f32.partialorder %v1073_v42, 11.2522  ;;  %vm1100_vm11 = vcmp.ge.f32.partialorder %v1073_v42, 11.2522  ;;  %vm1103_vm12 = vcmp.lt.f32.partialorder %v1073_v42, 18.5788 }
 0x2af   : > { %vm1094_vm6 = vmand %vm1088_vm7, %vm1091_vm10  ;;  %vm1112_vm0 = vcmp.ge.f32.partialorder %v1073_v42, 18.5788  ;;  %vm1115_vm8 = vcmp.lt.f32.partialorder %v1073_v42, 25.9054  ;;  %vm1124_vm14 = vcmp.ge.f32.partialorder %v1073_v42, 25.9054 }
 0x2b0   : > { %vm1106_vm13 = vmand %vm1100_vm11, %vm1103_vm12  ;;  %vm1127_vm15 = vcmp.le.f32.partialorder %v1073_v42, 33.232  ;;  %v1085_v33 = vsel %vm1082_vm9, 1.0, %v1824_v21  ;;  %v1512_v38 = vadd.f32 -3.9256, %v1073_v42  ;;  %v1097_v0 = vsel %vm1094_vm6, 1.0, %v1824_v21 }
 0x2b1   : > { %vm1118_vm1 = vmand %vm1112_vm0, %vm1115_vm8  ;;  %v1515_v48 = vadd.f32 3.401, %v1073_v42  ;;  %v1109_v37 = vsel %vm1106_vm13, 1.0, %v1824_v21  ;;  %v1518_v55 = vadd.f32 -11.2522, %v1073_v42 }
 0x2b2   : > { %vm1130_vm2 = vmand %vm1124_vm14, %vm1127_vm15  ;;  %v1521_v3 = vadd.f32 -18.5788, %v1073_v42  ;;  %v1121_v6 = vsel %vm1118_vm1, 1.0, %v1824_v21  ;;  %v1139_v51 = vmul.f32 -0.13648896, %v1512_v38 }
 0x2b3   : > { %v1133_v5 = vsel %vm1130_vm2, 1.0, %v1824_v21  ;;  %v1148_v7 = vmul.f32 0.13648896, %v1515_v48  ;;  %v1157_v9 = vmul.f32 -0.13648896, %v1518_v55 }
 0x2b4   : > { %v1166_v52 = vmul.f32 0.13648896, %v1512_v38  ;;  %v1175_v56 = vmul.f32 -0.13648896, %v1521_v3  ;;  %v1142_v11 = vmul.f32 %v1139_v51, %v1085_v33  ;;  %v1184_v60 = vmul.f32 0.13648896, %v1518_v55 }
 0x2b5   : > { %v1151_v19 = vmul.f32 %v1148_v7, %v1085_v33  ;;  %v1524_v14 = vadd.f32 -25.9054, %v1073_v42  ;;  %v1160_v4 = vmul.f32 %v1157_v9, %v1097_v0  ;;  %v1202_v57 = vmul.f32 0.13648896, %v1521_v3 }
 0x2b6   : > { %v1169_v63 = vmul.f32 %v1166_v52, %v1097_v0  ;;  %v1178_v22 = vmul.f32 %v1175_v56, %v1109_v37  ;;  %v1187_v43 = vmul.f32 %v1184_v60, %v1109_v37  ;;  %v1527_v24 = vadd.f32 -33.232, %v1073_v42 }
 0x2b7   : > { %v1193_v61 = vmul.f32 -0.13648896, %v1524_v14  ;;  %v1220_v25 = vmul.f32 0.13648896, %v1524_v14  ;;  %v1163_v46 = vadd.f32 %v1160_v4, %v1151_v19  ;;  %v1205_v8 = vmul.f32 %v1202_v57, %v1121_v6 }
 0x2b8   : > { %v1181_v26 = vadd.f32 %v1178_v22, %v1169_v63  ;;  %v1211_v62 = vmul.f32 -0.13648896, %v1527_v24  ;;  %v1226_v17 = vmul.f32 %v1142_v11, %v1139_v51  ;;  %v1229_v1 = vmul.f32 %v1148_v7, %v1142_v11 }
 0x2b9   : > { %v1196_v28 = vmul.f32 %v1193_v61, %v1121_v6  ;;  %v1223_v29 = vmul.f32 %v1220_v25, %v1133_v5  ;;  %v1232_v12 = vmul.f32 -0.06824448, %v1518_v55  ;;  %v1241_v18 = vmul.f32 0.06824448, %v1515_v48 }
 0x2ba   : > { %v1247_v30 = vmul.f32 -0.06824448, %v1521_v3  ;;  %v1214_v31 = vmul.f32 %v1211_v62, %v1133_v5  ;;  %v1256_v47 = vmul.f32 0.06824448, %v1512_v38  ;;  %v1262_v16 = vmul.f32 -0.06824448, %v1524_v14 }
 0x2bb   : > { %v1199_v53 = vadd.f32 %v1196_v28, %v1187_v43  ;;  %v1235_v41 = vmul.f32 %v1232_v12, %v1163_v46  ;;  %v1244_v13 = vmul.f32 %v1241_v18, %v1163_v46  ;;  %v1271_v54 = vmul.f32 0.06824448, %v1518_v55  ;;  %v969_v55 = vpop.permute.xlu1 %968 }
 0x2bc   : > { %v1250_v23 = vmul.f32 %v1247_v30, %v1181_v26  ;;  %v1217_v32 = vadd.f32 %v1214_v31, %v1205_v8  ;;  %v1259_v34 = vmul.f32 %v1256_v47, %v1181_v26  ;;  %v1277_v35 = vmul.f32 -0.06824448, %v1527_v24 }
 0x2bd   : > { %v1265_v2 = vmul.f32 %v1262_v16, %v1199_v53  ;;  %v1238_v36 = vadd.f32 %v1235_v41, %v1229_v1  ;;  %v1274_v42 = vmul.f32 %v1271_v54, %v1199_v53  ;;  %v1286_v44 = vmul.f32 0.06824448, %v1521_v3 }
 0x2be   : > { %v1253_v40 = vadd.f32 %v1250_v23, %v1244_v13  ;;  %v1280_v59 = vmul.f32 %v1277_v35, %v1217_v32  ;;  %v1303_v33 = vmul.f32 %v2339_v15, %v1226_v17  ;;  %v2363_v38 = vstv %s2357_s21 }
 0x2bf   : > { %v1268_v50 = vadd.f32 %v1265_v2, %v1259_v34  ;;  %v1289_v48 = vmul.f32 %v1286_v44, %v1217_v32  ;;  %v1292_v0 = vmul.f32 %v1223_v29, %v1211_v62  ;;  %v1308_v37 = vmul.f32 %v2341_v58, %v1238_v36 }
 0x2c0   : > { %vm1078_vm3 = vcmp.ge.f32.partialorder %v2359_v27, -3.401  ;;  %v1283_v6 = vadd.f32 %v1280_v59, %v1274_v42  ;;  %v1316_v5 = vmul.f32 %v2345_v45, %v1253_v40  ;;  %vm1081_vm4 = vcmp.lt.f32.partialorder %v2359_v27, 3.9256 }
 0x2c1   : > { %v2370_v3 = vadd.f32 %v2335_v39, %v969_v55  ;;  %v1295_v51 = vadd.f32 %v1292_v0, %v1289_v48  ;;  %v1311_v7 = vadd.f32 %v1308_v37, %v1303_v33  ;;  %vm1084_vm5 = vmand %vm1078_vm3, %vm1081_vm4  ;;  %vm1090_vm7 = vcmp.ge.f32.partialorder %v2359_v27, 3.9256 }
 0x2c2   : > { %vm1093_vm9 = vcmp.lt.f32.partialorder %v2359_v27, 11.2522  ;;  %v1298_v9 = vmul.f32 %v1223_v29, %v1220_v25  ;;  %v1324_v52 = vmul.f32 %v2348_v49, %v1268_v50  ;;  %vm1102_vm11 = vcmp.ge.f32.partialorder %v2359_v27, 11.2522 }
 0x2c3   : > { %vm1096_vm10 = vmand %vm1090_vm7, %vm1093_vm9  ;;  %vm1105_vm12 = vcmp.lt.f32.partialorder %v2359_v27, 18.5788  ;;  %v1319_v56 = vadd.f32 %v1316_v5, %v1311_v7  ;;  %v1332_v39 = vmul.f32 %v2355_v10, %v1283_v6  ;;  %v1087_v11 = vsel %vm1084_vm5, 1.0, %v1824_v21 }
 0x2c4   : > { %vm1108_vm6 = vmand %vm1102_vm11, %vm1105_vm12  ;;  %vm1114_vm0 = vcmp.ge.f32.partialorder %v2359_v27, 18.5788  ;;  %v1340_v19 = vmul.f32 %v2363_v38, %v1295_v51  ;;  %v1099_v60 = vsel %vm1096_vm10, 1.0, %v1824_v21  ;;  %vm1117_vm8 = vcmp.lt.f32.partialorder %v2359_v27, 25.9054 }
 0x2c5   : > { %vm1126_vm13 = vcmp.ge.f32.partialorder %v2359_v27, 25.9054  ;;  %v1327_v14 = vadd.f32 %v1324_v52, %v1319_v56  ;;  %vm1120_vm14 = vmand %vm1114_vm0, %vm1117_vm8  ;;  %vm1129_vm15 = vcmp.le.f32.partialorder %v2359_v27, 33.232  ;;  %v1514_v4 = vadd.f32 -3.9256, %v2359_v27 }
 0x2c6   : > { %v1517_v63 = vadd.f32 3.401, %v2359_v27  ;;  %v1111_v22 = vsel %vm1108_vm6, 1.0, %v1824_v21  ;;  %v1123_v57 = vsel %vm1120_vm14, 1.0, %v1824_v21  ;;  %vm1132_vm1 = vmand %vm1126_vm13, %vm1129_vm15  ;;  %v1520_v43 = vadd.f32 -11.2522, %v2359_v27 }
 0x2c7   : > { %v1523_v61 = vadd.f32 -18.5788, %v2359_v27  ;;  %v1335_v24 = vadd.f32 %v1332_v39, %v1327_v14  ;;  %v1135_v25 = vsel %vm1132_vm1, 1.0, %v1824_v21  ;;  %v1141_v46 = vmul.f32 -0.13648896, %v1514_v4 }
 0x2c8   : > { %v1150_v26 = vmul.f32 0.13648896, %v1517_v63  ;;  %v1348_v8 = vmul.f32 %v2343_v20, %v1298_v9  ;;  %v1159_v28 = vmul.f32 -0.13648896, %v1520_v43  ;;  %v1168_v62 = vmul.f32 0.13648896, %v1514_v4 }
 0x2c9   : > { %v1177_v29 = vmul.f32 -0.13648896, %v1523_v61  ;;  %v1343_v17 = vadd.f32 %v1340_v19, %v1335_v24  ;;  %v1144_v1 = vmul.f32 %v1141_v46, %v1087_v11  ;;  %v1186_v18 = vmul.f32 0.13648896, %v1520_v43 }
 0x2ca   : > { %v1153_v12 = vmul.f32 %v1150_v26, %v1087_v11  ;;  %v1162_v30 = vmul.f32 %v1159_v28, %v1099_v60  ;;  %v1171_v53 = vmul.f32 %v1168_v62, %v1099_v60  ;;  %v1526_v47 = vadd.f32 -25.9054, %v2359_v27 }
 0x2cb   : > { %v1180_v31 = vmul.f32 %v1177_v29, %v1111_v22  ;;  %v1351_v16 = vadd.f32 %v1348_v8, %v1343_v17  ;;  %v1189_v41 = vmul.f32 %v1186_v18, %v1111_v22  ;;  %v1204_v13 = vmul.f32 0.13648896, %v1523_v61 }
 0x2cc   : > { %v1529_v23 = vadd.f32 -33.232, %v2359_v27  ;;  %v1165_v54 = vadd.f32 %v1162_v30, %v1153_v12  ;;  %v1195_v34 = vmul.f32 -0.13648896, %v1526_v47  ;;  %v1222_v2 = vmul.f32 0.13648896, %v1526_v47 }
 0x2cd   : > { %v1183_v32 = vadd.f32 %v1180_v31, %v1171_v53  ;;  %1354 = vst [vmem:[%s2399_s23] sm:$0xff] %v1351_v16  ;;  %v1207_v35 = vmul.f32 %v1204_v13, %v1123_v57  ;;  %v1228_v40 = vmul.f32 %v1144_v1, %v1141_v46  ;;  %v1231_v42 = vmul.f32 %v1150_v26, %v1144_v1 }
 0x2ce   : > { %v1213_v36 = vmul.f32 -0.13648896, %v1529_v23  ;;  %v1198_v44 = vmul.f32 %v1195_v34, %v1123_v57  ;;  %v1225_v50 = vmul.f32 %v1222_v2, %v1135_v25  ;;  %v1234_v59 = vmul.f32 -0.06824448, %v1520_v43 }
 0x2cf   : > { %v1243_v33 = vmul.f32 0.06824448, %v1517_v63  ;;  %v1249_v0 = vmul.f32 -0.06824448, %v1523_v61  ;;  %v1258_v37 = vmul.f32 0.06824448, %v1514_v4  ;;  %v1305_v24 = vmul.f32 %v2339_v15, %v1228_v40 }
 0x2d0   : > { %v1216_v48 = vmul.f32 %v1213_v36, %v1135_v25  ;;  %v1264_v27 = vmul.f32 -0.06824448, %v1526_v47  ;;  %v1201_v55 = vadd.f32 %v1198_v44, %v1189_v41  ;;  %v1237_v6 = vmul.f32 %v1234_v59, %v1165_v54 }
 0x2d1   : > { %v1246_v5 = vmul.f32 %v1243_v33, %v1165_v54  ;;  %v1273_v51 = vmul.f32 0.06824448, %v1520_v43  ;;  %v1252_v9 = vmul.f32 %v1249_v0, %v1183_v32  ;;  %v1261_v52 = vmul.f32 %v1258_v37, %v1183_v32 }
 0x2d2   : > { %v1219_v7 = vadd.f32 %v1216_v48, %v1207_v35  ;;  %v1279_v56 = vmul.f32 -0.06824448, %v1529_v23  ;;  %v1240_v39 = vadd.f32 %v1237_v6, %v1231_v42  ;;  %v1267_v11 = vmul.f32 %v1264_v27, %v1201_v55 }
 0x2d3   : > { %v1276_v19 = vmul.f32 %v1273_v51, %v1201_v55  ;;  %v1288_v60 = vmul.f32 0.06824448, %v1523_v61  ;;  %v1255_v14 = vadd.f32 %v1252_v9, %v1246_v5  ;;  %v1071_v46 = vmax.f32 %v2370_v3, -3.401 }
 0x2d4   : > { %v1282_v22 = vmul.f32 %v1279_v56, %v1219_v7  ;;  %v1270_v57 = vadd.f32 %v1267_v11, %v1261_v52  ;;  %v1310_v4 = vmul.f32 %v2341_v58, %v1240_v39  ;;  %v1294_v43 = vmul.f32 %v1225_v50, %v1213_v36 }
 0x2d5   : > { %v1291_v63 = vmul.f32 %v1288_v60, %v1219_v7  ;;  %v1318_v8 = vmul.f32 %v2345_v45, %v1255_v14  ;;  %v1300_v28 = vmul.f32 %v1225_v50, %v1222_v2  ;;  %v1074_v62 = vmin.f32 %v1071_v46, 33.232 }
 0x2d6   : > { %v1285_v25 = vadd.f32 %v1282_v22, %v1276_v19  ;;  %v1313_v26 = vadd.f32 %v1310_v4, %v1305_v24  ;;  %v1326_v61 = vmul.f32 %v2348_v49, %v1270_v57 }
 0x2d7   : > { %v1297_v29 = vadd.f32 %v1294_v43, %v1291_v63  ;;  %vm1077_vm2 = vcmp.ge.f32.partialorder %v1074_v62, -3.401  ;;  %vm1080_vm3 = vcmp.lt.f32.partialorder %v1074_v62, 3.9256  ;;  %vm1089_vm4 = vcmp.ge.f32.partialorder %v1074_v62, 3.9256 }
 0x2d8   : > { %v1321_v17 = vadd.f32 %v1318_v8, %v1313_v26  ;;  %v1334_v1 = vmul.f32 %v2355_v10, %v1285_v25  ;;  %vm1083_vm5 = vmand %vm1077_vm2, %vm1080_vm3  ;;  %vm1092_vm7 = vcmp.lt.f32.partialorder %v1074_v62, 11.2522  ;;  %vm1101_vm9 = vcmp.ge.f32.partialorder %v1074_v62, 11.2522 }
 0x2d9   : > { %vm1104_vm10 = vcmp.lt.f32.partialorder %v1074_v62, 18.5788  ;;  %v1350_v3 = vmul.f32 %v2343_v20, %v1300_v28  ;;  %vm1095_vm11 = vmand %vm1089_vm4, %vm1092_vm7  ;;  %vm1113_vm12 = vcmp.ge.f32.partialorder %v1074_v62, 18.5788  ;;  %vm1116_vm6 = vcmp.lt.f32.partialorder %v1074_v62, 25.9054 }
 0x2da   : > { %v1329_v12 = vadd.f32 %v1326_v61, %v1321_v17  ;;  %v1342_v30 = vmul.f32 %v2363_v38, %v1297_v29  ;;  %vm1107_vm0 = vmand %vm1101_vm9, %vm1104_vm10  ;;  %vm1125_vm8 = vcmp.ge.f32.partialorder %v1074_v62, 25.9054  ;;  %vm1128_vm13 = vcmp.le.f32.partialorder %v1074_v62, 33.232 }
 0x2db   : > { %v1086_v53 = vsel %vm1083_vm5, 1.0, %v1824_v21  ;;  %v1098_v31 = vsel %vm1095_vm11, 1.0, %v1824_v21  ;;  %vm1119_vm14 = vmand %vm1113_vm12, %vm1116_vm6  ;;  %v1513_v47 = vadd.f32 -3.9256, %v1074_v62  ;;  %v1516_v16 = vadd.f32 3.401, %v1074_v62 }
 0x2dc   : > { %v1337_v18 = vadd.f32 %v1334_v1, %v1329_v12  ;;  %v1110_v13 = vsel %vm1107_vm0, 1.0, %v1824_v21  ;;  %vm1131_vm15 = vmand %vm1125_vm8, %vm1128_vm13  ;;  %v1519_v23 = vadd.f32 -11.2522, %v1074_v62  ;;  %v1522_v54 = vadd.f32 -18.5788, %v1074_v62 }
 0x2dd   : > { %v1122_v32 = vsel %vm1119_vm14, 1.0, %v1824_v21  ;;  %v1134_v34 = vsel %vm1131_vm15, 1.0, %v1824_v21  ;;  %v1140_v2 = vmul.f32 -0.13648896, %v1513_v47  ;;  %v1149_v35 = vmul.f32 0.13648896, %v1516_v16 }
 0x2de   : > { %v1345_v41 = vadd.f32 %v1342_v30, %v1337_v18  ;;  %v1158_v40 = vmul.f32 -0.13648896, %v1519_v23  ;;  %v1167_v42 = vmul.f32 0.13648896, %v1513_v47  ;;  %v1176_v44 = vmul.f32 -0.13648896, %v1522_v54 }
 0x2df   : > { %v1143_v50 = vmul.f32 %v1140_v2, %v1086_v53  ;;  %v1152_v59 = vmul.f32 %v1149_v35, %v1086_v53  ;;  %v1185_v33 = vmul.f32 0.13648896, %v1519_v23  ;;  %v1525_v48 = vadd.f32 -25.9054, %v1074_v62 }
 0x2e0   : > { %v1353_v36 = vadd.f32 %v1350_v3, %v1345_v41  ;;  %v1161_v0 = vmul.f32 %v1158_v40, %v1098_v31  ;;  %v1170_v37 = vmul.f32 %v1167_v42, %v1098_v31  ;;  %v1179_v27 = vmul.f32 %v1176_v44, %v1110_v13 }
 0x2e1   : > { %v1203_v55 = vmul.f32 0.13648896, %v1522_v54  ;;  %v1188_v6 = vmul.f32 %v1185_v33, %v1110_v13  ;;  %v1194_v5 = vmul.f32 -0.13648896, %v1525_v48  ;;  %v1528_v51 = vadd.f32 -33.232, %v1074_v62 }
 0x2e2   : > { %1356 = vst [vmem:[%s2399_s23 + $0x10] sm:$0x7] %v1353_v36  ;;  %v1221_v7 = vmul.f32 0.13648896, %v1525_v48  ;;  %v1164_v21 = vadd.f32 %v1161_v0, %v1152_v59  ;;  %v1182_v9 = vadd.f32 %v1179_v27, %v1170_v37  ;;  %v1227_v19 = vmul.f32 %v1143_v50, %v1140_v2 }
 0x2e3   : > { %v1206_v52 = vmul.f32 %v1203_v55, %v1122_v32  ;;  %v1197_v56 = vmul.f32 %v1194_v5, %v1122_v32  ;;  %v1212_v39 = vmul.f32 -0.13648896, %v1528_v51  ;;  %v1230_v60 = vmul.f32 %v1149_v35, %v1143_v50 }
 0x2e4   : > { %v1224_v11 = vmul.f32 %v1221_v7, %v1134_v34  ;;  %v1233_v14 = vmul.f32 -0.06824448, %v1519_v23  ;;  %v1242_v22 = vmul.f32 0.06824448, %v1516_v16  ;;  %v1248_v57 = vmul.f32 -0.06824448, %v1522_v54 }
 0x2e5   : > { %v1200_v63 = vadd.f32 %v1197_v56, %v1188_v6  ;;  %v1215_v24 = vmul.f32 %v1212_v39, %v1134_v34  ;;  %v1257_v4 = vmul.f32 0.06824448, %v1513_v47  ;;  %v1263_v25 = vmul.f32 -0.06824448, %v1525_v48 }
 0x2e6   : > { %v1236_v46 = vmul.f32 %v1233_v14, %v1164_v21  ;;  %v1245_v43 = vmul.f32 %v1242_v22, %v1164_v21  ;;  %v1251_v26 = vmul.f32 %v1248_v57, %v1182_v9  ;;  %v1272_v8 = vmul.f32 0.06824448, %v1519_v23 }
 0x2e7   : > { %v1218_v28 = vadd.f32 %v1215_v24, %v1206_v52  ;;  %v1260_v62 = vmul.f32 %v1257_v4, %v1182_v9  ;;  %v1266_v29 = vmul.f32 %v1263_v25, %v1200_v63  ;;  %v1278_v17 = vmul.f32 -0.06824448, %v1528_v51 }
 0x2e8   : > { %v1239_v61 = vadd.f32 %v1236_v46, %v1230_v60  ;;  %v1254_v1 = vadd.f32 %v1251_v26, %v1245_v43  ;;  %v1275_v12 = vmul.f32 %v1272_v8, %v1200_v63  ;;  %v1287_v3 = vmul.f32 0.06824448, %v1522_v54 }
 0x2e9   : > { %v1281_v18 = vmul.f32 %v1278_v17, %v1218_v28  ;;  %v1269_v30 = vadd.f32 %v1266_v29, %v1260_v62  ;;  %v1304_v31 = vmul.f32 %v2339_v15, %v1227_v19  ;;  %v1293_v41 = vmul.f32 %v1224_v11, %v1212_v39  ;;  %v1401_v50 = vld [vmem:[%s2399_s23 + $0x10] sm:$0xff] (%p2477_p7) }
 0x2ea   : > { %v1290_v53 = vmul.f32 %v1287_v3, %v1218_v28  ;;  %v1309_v47 = vmul.f32 %v2341_v58, %v1239_v61  ;;  %v1317_v23 = vmul.f32 %v2345_v45, %v1254_v1  ;;  %v1299_v35 = vmul.f32 %v1224_v11, %v1221_v7  ;;  %v1397_v45 = vld [vmem:[%s2399_s23] sm:$0xff] (%p2477_p7)  ;;  %1402 = vst [vmem:[%s1365_s10 + $0x30] sm:$0xff] (%p2477_p7), %v1401_v50 }
 0x2eb   : > { %v1284_v16 = vadd.f32 %v1281_v18, %v1275_v12  ;;  %v1325_v2 = vmul.f32 %v2348_v49, %v1269_v30  ;;  %1398 = vst [vmem:[%s1365_s10] sm:$0xff] (%p2477_p7), %v1397_v45 }
 0x2ec   : > { %v1312_v13 = vadd.f32 %v1309_v47, %v1304_v31  ;;  %v1296_v32 = vadd.f32 %v1293_v41, %v1290_v53  ;;  %v1349_v58 = vmul.f32 %v2343_v20, %v1299_v35 }
 0x2ed   : > { %v1333_v54 = vmul.f32 %v2355_v10, %v1284_v16 }
 0x2ee   : > { %v1320_v34 = vadd.f32 %v1317_v23, %v1312_v13  ;;  %v1341_v42 = vmul.f32 %v2363_v38, %v1296_v32 }
 0x2f0   : > { %v1328_v36 = vadd.f32 %v1325_v2, %v1320_v34 }
 0x2f2   : > { %v1336_v40 = vadd.f32 %v1333_v54, %v1328_v36  ;;  %1363 = sbr.rel (!%p2477_p7) target bundleno = 769 (0x301), region = 60 }
 0x2f4   : > { %v1344_v15 = vadd.f32 %v1341_v42, %v1336_v40 }
 0x2f6   : > { %v1352_v44 = vadd.f32 %v1349_v58, %v1344_v15 }
 0x2f8   : > { %1355 = vst [vmem:[%s2399_s23 + $0x8] sm:$0xff] %v1352_v44 }
 0x2ff   : > { %v1399_v49 = vld [vmem:[%s2399_s23 + $0x8] sm:$0xff] }
 0x300   : > { %1400 = vst [vmem:[%s1365_s10 + $0x18] sm:$0xff] %v1399_v49 }
 0x301 PF: > { %p16_p9 = scmp.ge.s32.totalorder %s1881_s28, 5   ;;  %s2478_s24 = smov %s1813_s25 }
 0x302   : > { %s2479_s25 = smov %s1889_s8  ;;  %s2480_s26 = smov %s1881_s28 }
 0x303   :  { %18 = sbr.rel (!%p16_p9) target bundleno = 3 (0x3), region = 125 }
 0x30a   :  { %1418 = vsyncpa [#allocation3], 1 }
 0x30b   :  { %1420 = vsyncpa [#allocation3 + $0x1], 1 }
 0x30c   :  { %1421 = vsyncpa [#allocation5], 1 }

</bundles_post_ra>
